<compile_context>
chip_gen: v7x
topology: tpu7x:2x2x1
jax: 0.10.0
libtpu: 0.0.40
codegen_flags: <defaults>
</compile_context>

<pallas_src>
import functools
import math

import jax
import jax.numpy as jnp
from jax.experimental import pallas as pl
from jax.experimental.pallas import tpu as pltpu

BN_EPS = 1e-5


# ---------------------------------------------------------------------------
# Fused bottleneck kernel (one image per grid step)
# ---------------------------------------------------------------------------
def _bottleneck_kernel(*refs, stride, has_down, H, W, Ho, Wo):
    if has_down:
        (x_ref, w1_ref, b1_ref, w2_ref, b2_ref, w3_ref, b3_ref,
         wd_ref, o_ref, pad_ref) = refs
    else:
        (x_ref, w1_ref, b1_ref, w2_ref, b2_ref, w3_ref, b3_ref,
         o_ref, pad_ref) = refs
        wd_ref = None

    f32 = jnp.float32
    bf16 = jnp.bfloat16
    Cmid = w1_ref.shape[1]

    # ---- conv1 (1x1, BN-scale folded into w1) + bias + relu ---------------
    if stride == 1:
        xv = x_ref[0]                                     # (H*W, Cin) bf16
    else:
        # x arrives parity-split: (4, Ho*Wo, Cin); quadrant 0 = even/even.
        xv = x_ref[0].reshape(H * W, x_ref.shape[-1])
    y1 = jnp.dot(xv, w1_ref[...], preferred_element_type=f32)
    y1 = jnp.maximum(y1 + b1_ref[...], 0.0)

    # ---- conv2 padded input lives in VMEM scratch; zero only the halo -----
    if stride == 1:
        # pad_ref: (H+2, W+2, Cmid); interior fully overwritten below.
        pad_ref[0:1, :, :] = jnp.zeros((1, W + 2, Cmid), bf16)
        pad_ref[H + 1:H + 2, :, :] = jnp.zeros((1, W + 2, Cmid), bf16)
        pad_ref[1:H + 1, 0:1, :] = jnp.zeros((H, 1, Cmid), bf16)
        pad_ref[1:H + 1, W + 1:W + 2, :] = jnp.zeros((H, 1, Cmid), bf16)
        pad_ref[1:H + 1, 1:W + 1, :] = y1.reshape(H, W, Cmid).astype(bf16)
    else:
        # pad_ref: (row_parity, col_parity, Ho+1, Wo+1, Cmid)
        # pad_ref[rp, cp, rq, cq] == padded_out1[2*rq + rp, 2*cq + cp]
        # Only the halo slices that are actually read need zeroing.
        z_row = jnp.zeros((1, Wo + 1, Cmid), bf16)
        z_col = jnp.zeros((Ho + 1, 1, Cmid), bf16)
        pad_ref[0, 0, 0:1, :, :] = z_row
        pad_ref[0, 0, :, 0:1, :] = z_col
        pad_ref[0, 1, 0:1, :, :] = z_row
        pad_ref[1, 0, :, 0:1, :] = z_col
        y1q = y1.reshape(4, Ho, Wo, Cmid).astype(bf16)
        pad_ref[1, 1, 0:Ho, 0:Wo, :] = y1q[0]             # even rows / even cols
        pad_ref[1, 0, 0:Ho, 1:Wo + 1, :] = y1q[1]         # even rows / odd  cols
        pad_ref[0, 1, 1:Ho + 1, 0:Wo, :] = y1q[2]         # odd  rows / even cols
        pad_ref[0, 0, 1:Ho + 1, 1:Wo + 1, :] = y1q[3]     # odd  rows / odd  cols

    # ---- conv2 (3x3, stride, pad=1): 9 per-tap MXU dots, f32 accumulate ---
    y2 = None
    for kh in range(3):
        for kw in range(3):
            if stride == 1:
                tap = pad_ref[kh:kh + Ho, kw:kw + Wo, :]
            else:
                # tap (kh,kw) at output (i,j) reads padded_out1[2i+kh, 2j+kw]
                tap = pad_ref[kh % 2, kw % 2,
                              kh // 2:kh // 2 + Ho,
                              kw // 2:kw // 2 + Wo, :]
            d = jnp.dot(tap.reshape(Ho * Wo, Cmid), w2_ref[kh * 3 + kw],
                        preferred_element_type=f32)
            y2 = d if y2 is None else y2 + d
    y2 = jnp.maximum(y2 + b2_ref[...], 0.0)

    # ---- conv3 (1x1) + identity branch share one f32 accumulator ----------
    y3 = jnp.dot(y2.astype(bf16), w3_ref[...], preferred_element_type=f32)
    if has_down:
        idv = x_ref[0, 0] if stride == 2 else xv          # (Ho*Wo, Cin) bf16
        y3 = y3 + jnp.dot(idv, wd_ref[...], preferred_element_type=f32)
        y3 = y3 + b3_ref[...]           # b3 already holds bn3-shift + down_bn-shift
    else:
        y3 = y3 + b3_ref[...] + xv      # identity add (bf16 promotes to f32)

    o_ref[0] = jnp.maximum(y3, 0.0).astype(o_ref.dtype)


# ---------------------------------------------------------------------------
# Wrapper (parameter folding / layout prep = plain JAX glue)
# ---------------------------------------------------------------------------
def _fold_bn(bn):
    gamma, beta, mean, var = bn
    scale = gamma / jnp.sqrt(var + BN_EPS)
    shift = beta - mean * scale
    return scale.astype(jnp.float32), shift.astype(jnp.float32)


def _const_spec(a):
    """Whole-array block, constant index map -> stays resident in VMEM."""
    ndim = a.ndim
    return pl.BlockSpec(a.shape, lambda n, _nd=ndim: (0,) * _nd)


def bottleneck_forward(x_nchw, p, stride=1):
    if stride not in (1, 2):
        raise ValueError("only stride 1 or 2 is supported")

    N, Cin, H, W = x_nchw.shape
    Ho = (H - 1) // stride + 1
    Wo = (W - 1) // stride + 1
    has_down = "down_conv_w" in p

    # --- fold BN scales into the (bf16) weights; biases are the epilogues ---
    s1, b1 = _fold_bn(p["bn1"])
    s2, b2 = _fold_bn(p["bn2"])
    s3, b3 = _fold_bn(p["bn3"])
    w1 = (jnp.transpose(p["conv1_w"][:, :, 0, 0], (1, 0))
          * s1[None, :]).astype(jnp.bfloat16)                   # (Cin, Cmid)
    Cmid = w1.shape[1]
    w2 = jnp.transpose(p["conv2_w"], (2, 3, 1, 0)) * s2[None, None, None, :]
    w2 = w2.reshape(9, Cmid, Cmid).astype(jnp.bfloat16)         # (9, Cmid, Cmid)
    w3 = (jnp.transpose(p["conv3_w"][:, :, 0, 0], (1, 0))
          * s3[None, :]).astype(jnp.bfloat16)                   # (Cmid, Cout)
    Cout = w3.shape[1]
    b1 = b1[None, :]
    b2 = b2[None, :]
    b3c = b3
    if has_down:
        sd, bd = _fold_bn(p["down_bn"])
        wd = (jnp.transpose(p["down_conv_w"][:, :, 0, 0], (1, 0))
              * sd[None, :]).astype(jnp.bfloat16)               # (Cin, Cout)
        b3c = b3 + bd                 # single combined bias for the residual merge
    b3c = b3c[None, :]

    # --- single-pass layout prep for x: NCHW -> (parity-)NHWC + bf16 cast ---
    if stride == 1:
        x_in = jnp.transpose(x_nchw, (0, 2, 3, 1)).reshape(
            N, H * W, Cin).astype(jnp.bfloat16)
        x_spec = pl.BlockSpec((1, H * W, Cin), lambda n: (n, 0, 0))
        pad_scratch = pltpu.VMEM((H + 2, W + 2, Cmid), jnp.bfloat16)
        pad_elems = (H + 2) * (W + 2) * Cmid
    else:
        if H % 2 or W % 2:
            raise ValueError("stride-2 path requires even H and W")
        if not has_down:
            raise ValueError("stride != 1 requires a downsample branch")
        # Deinterleave even/odd rows & cols, transpose to channel-last and cast
        # to bf16 in one pass so the kernel never issues strided accesses.
        x_in = jnp.transpose(
            x_nchw.reshape(N, Cin, Ho, 2, Wo, 2), (0, 3, 5, 2, 4, 1)
        ).reshape(N, 4, Ho * Wo, Cin).astype(jnp.bfloat16)
        x_spec = pl.BlockSpec((1, 4, Ho * Wo, Cin), lambda n: (n, 0, 0, 0))
        pad_scratch = pltpu.VMEM((2, 2, Ho + 1, Wo + 1, Cmid), jnp.bfloat16)
        pad_elems = 4 * (Ho + 1) * (Wo + 1) * Cmid

    if not has_down and (stride != 1 or Cin != Cout):
        raise ValueError("identity path requires stride == 1 and Cin == 4*Cmid")

    inputs = [x_in, w1, b1, w2, b2, w3, b3c]
    if has_down:
        inputs.append(wd)
    in_specs = [x_spec] + [_const_spec(a) for a in inputs[1:]]

    # VMEM budget: double-buffered bf16 x/out blocks + resident weights/biases
    # + pad scratch + headroom for in-kernel f32 temporaries.
    x_blk = math.prod(x_in.shape[1:])
    o_blk = Ho * Wo * Cout
    act_bytes = 2 * 2 * (x_blk + o_blk)
    w_bytes = 2 * sum(int(a.size) * a.dtype.itemsize for a in inputs[1:])
    vmem_limit = int(min(act_bytes + w_bytes + 2 * pad_elems + (16 << 20),
                         128 << 20))

    kernel = functools.partial(_bottleneck_kernel, stride=stride,
                               has_down=has_down, H=H, W=W, Ho=Ho, Wo=Wo)
    out = pl.pallas_call(
        kernel,
        out_shape=jax.ShapeDtypeStruct((N, Ho * Wo, Cout), jnp.bfloat16),
        grid=(N,),
        in_specs=in_specs,
        out_specs=pl.BlockSpec((1, Ho * Wo, Cout), lambda n: (n, 0, 0)),
        scratch_shapes=[pad_scratch],
        compiler_params=pltpu.CompilerParams(
            dimension_semantics=("parallel",),
            vmem_limit_bytes=vmem_limit),
    )(*inputs)

    out = out.reshape(N, Ho, Wo, Cout)
    return jnp.transpose(out, (0, 3, 1, 2)).astype(jnp.float32)   # NHWC -> NCHW


# ---------------------------------------------------------------------------
# Deterministic parameter init (shapes follow Bottleneck.__init__)
# ---------------------------------------------------------------------------
def init_bottleneck_params(key, in_channel, out_channel, with_downsample=False):
    expansion = 4
    k = jax.random.split(key, 8)

    def conv_w(kk, cout, cin, ks):
        fan_in = cin * ks * ks
        return jax.random.normal(kk, (cout, cin, ks, ks), jnp.float32) / jnp.sqrt(fan_in)

    def bn_p(kk, c):
        k1, k2, k3, k4 = jax.random.split(kk, 4)
        gamma = 1.0 + 0.1 * jax.random.normal(k1, (c,), jnp.float32)
        beta = 0.1 * jax.random.normal(k2, (c,), jnp.float32)
        mean = 0.1 * jax.random.normal(k3, (c,), jnp.float32)
        var = 1.0 + 0.1 * jnp.abs(jax.random.normal(k4, (c,), jnp.float32))
        return (gamma, beta, mean, var)

    params = {
        "conv1_w": conv_w(k[0], out_channel, in_channel, 1),
        "bn1": bn_p(k[1], out_channel),
        "conv2_w": conv_w(k[2], out_channel, out_channel, 3),
        "bn2": bn_p(k[3], out_channel),
        "conv3_w": conv_w(k[4], out_channel * expansion, out_channel, 1),
        "bn3": bn_p(k[5], out_channel * expansion),
    }
    if with_downsample:
        params["down_conv_w"] = conv_w(k[6], out_channel * expansion, in_channel, 1)
        params["down_bn"] = bn_p(k[7], out_channel * expansion)
    return params


# ---------------------------------------------------------------------------
# Plain-JAX reference (bf16-operand convs, f32 BN applied after the conv)
# ---------------------------------------------------------------------------
def bottleneck_reference(x_nchw, p, stride=1):
    def conv(x, w, s, padding):
        return jax.lax.conv_general_dilated(
            x.astype(jnp.bfloat16), w.astype(jnp.bfloat16), (s, s), padding,
            dimension_numbers=("NCHW", "OIHW", "NCHW"),
            preferred_element_type=jnp.float32)

    def bn(x, bn_p):
        gamma, beta, mean, var = bn_p
        scale = gamma / jnp.sqrt(var + BN_EPS)
        shift = beta - mean * scale
        return x * scale[None, :, None, None] + shift[None, :, None, None]

    identity = x_nchw
    if "down_conv_w" in p:
        identity = bn(conv(x_nchw, p["down_conv_w"], stride, "VALID"), p["down_bn"])
    out = jax.nn.relu(bn(conv(x_nchw, p["conv1_w"], 1, "VALID"), p["bn1"]))
    out = jax.nn.relu(bn(conv(out, p["conv2_w"], stride, [(1, 1), (1, 1)]), p["bn2"]))
    out = bn(conv(out, p["conv3_w"], 1, "VALID"), p["bn3"])
    return jax.nn.relu(out + identity)


if __name__ == "__main__":
    key = jax.random.PRNGKey(0)

    configs = [
        # (in_channel, out_channel, stride, with_downsample, N, H, W)
        (16, 4, 1, False, 2, 8, 8),       # tiny: stride=1, identity shortcut
        (16, 8, 2, True, 2, 8, 8),        # tiny: strided block with downsample
        (256, 64, 1, False, 1, 14, 14),   # realistic lane-aligned channels
        (256, 128, 2, True, 1, 14, 14),   # realistic strided + downsample
    ]

    for in_c, mid_c, stride, with_down, N, H, W in configs:
        key, kx, kp = jax.random.split(key, 3)
        x = jax.random.normal(kx, (N, in_c, H, W), jnp.float32)
        params = init_bottleneck_params(kp, in_c, mid_c, with_downsample=with_down)

        fwd = jax.jit(functools.partial(bottleneck_forward, stride=stride))
        out = jax.block_until_ready(fwd(x, params))

        ref = bottleneck_reference(x, params, stride=stride)
        Ho = (H - 1) // stride + 1
        Wo = (W - 1) // stride + 1
        assert out.shape == (N, mid_c * 4, Ho, Wo), out.shape
        max_err = float(jnp.max(jnp.abs(out - ref)))
        # Tolerance accounts for bf16-quantized BN-folded weights and the bf16
        # output at the pallas_call boundary vs the f32-BN reference.
        assert jnp.allclose(out, ref, atol=5e-2, rtol=2e-2), \
            f"cfg in={in_c} mid={mid_c} stride={stride} down={with_down}: max abs err {max_err}"

    print("KERNEL_OK")
</pallas_src>

<mosaic_0001>
module attributes {stable_mosaic.version = 11 : i64} {
  func.func @_bottleneck_kernel(%arg0: i32, %arg1: memref<1x64x16xbf16, #tpu.memory_space<vmem>>, %arg2: memref<16x4xbf16, #tpu.memory_space<vmem>>, %arg3: memref<1x4xf32, #tpu.memory_space<vmem>>, %arg4: memref<9x4x4xbf16, #tpu.memory_space<vmem>>, %arg5: memref<1x4xf32, #tpu.memory_space<vmem>>, %arg6: memref<4x16xbf16, #tpu.memory_space<vmem>>, %arg7: memref<1x16xf32, #tpu.memory_space<vmem>>, %arg8: memref<1x64x16xbf16, #tpu.memory_space<vmem>>, %arg9: memref<10x10x4xbf16, #tpu.memory_space<vmem>>) attributes {dimension_semantics = [#tpu.dimension_semantics<parallel>], iteration_bounds = array<i64: 2>, scalar_prefetch = 0 : i64, scratch_operands = 1 : i64, tpu.core_type = #tpu.core_type<tc>, window_params = [{transform_indices = @transform_0, window_bounds = array<i64: 1, 64, 16>}, {pipeline_mode = #tpu.pipeline_mode<synchronous>, transform_indices = @transform_1, window_bounds = array<i64: 16, 4>}, {pipeline_mode = #tpu.pipeline_mode<synchronous>, transform_indices = @transform_2, window_bounds = array<i64: 1, 4>}, {pipeline_mode = #tpu.pipeline_mode<synchronous>, transform_indices = @transform_3, window_bounds = array<i64: 9, 4, 4>}, {pipeline_mode = #tpu.pipeline_mode<synchronous>, transform_indices = @transform_4, window_bounds = array<i64: 1, 4>}, {pipeline_mode = #tpu.pipeline_mode<synchronous>, transform_indices = @transform_5, window_bounds = array<i64: 4, 16>}, {pipeline_mode = #tpu.pipeline_mode<synchronous>, transform_indices = @transform_6, window_bounds = array<i64: 1, 16>}, {transform_indices = @transform_7, window_bounds = array<i64: 1, 64, 16>}]} {
    %c0 = arith.constant 0 : index
    %c0_0 = arith.constant 0 : index
    %c0_1 = arith.constant 0 : index
    %0 = vector.load %arg1[%c0, %c0_0, %c0_1] : memref<1x64x16xbf16, #tpu.memory_space<vmem>>, vector<1x64x16xbf16>
    %1 = vector.shape_cast %0 : vector<1x64x16xbf16> to vector<64x16xbf16>
    %c0_2 = arith.constant 0 : index
    %c0_3 = arith.constant 0 : index
    %2 = vector.load %arg2[%c0_2, %c0_3] : memref<16x4xbf16, #tpu.memory_space<vmem>>, vector<16x4xbf16>
    %cst = arith.constant dense<0.000000e+00> : vector<64x4xf32>
    %3 = tpu.matmul %1, %2, %cst {dimension_numbers = #tpu.dot_dimension_numbers<[1], [0], [0], [1], [0, 0, 1, 1], [], []>} : vector<64x16xbf16>, vector<16x4xbf16>, vector<64x4xf32> -> vector<64x4xf32>
    %c0_4 = arith.constant 0 : index
    %c0_5 = arith.constant 0 : index
    %4 = vector.load %arg3[%c0_4, %c0_5] : memref<1x4xf32, #tpu.memory_space<vmem>>, vector<1x4xf32>
    %5 = vector.broadcast %4 : vector<1x4xf32> to vector<64x4xf32>
    %6 = arith.addf %3, %5 : vector<64x4xf32>
    %cst_6 = arith.constant 0.000000e+00 : f32
    %7 = vector.broadcast %cst_6 : f32 to vector<64x4xf32>
    %8 = arith.maximumf %6, %7 : vector<64x4xf32>
    %cst_7 = arith.constant 0.000000e+00 : bf16
    %9 = vector.broadcast %cst_7 : bf16 to vector<1x10x4xbf16>
    %c0_8 = arith.constant 0 : index
    %c0_9 = arith.constant 0 : index
    %c0_10 = arith.constant 0 : index
    %10 = vector.load %arg9[%c0_8, %c0_9, %c0_10] : memref<10x10x4xbf16, #tpu.memory_space<vmem>>, vector<1x10x4xbf16>
    tpu.vector_store %arg9[%c0_8, %c0_9, %c0_10], %9 {strides = array<i32>} : memref<10x10x4xbf16, #tpu.memory_space<vmem>>, vector<1x10x4xbf16>,
    %cst_11 = arith.constant 0.000000e+00 : bf16
    %11 = vector.broadcast %cst_11 : bf16 to vector<1x10x4xbf16>
    %c9 = arith.constant 9 : index
    %c0_12 = arith.constant 0 : index
    %c0_13 = arith.constant 0 : index
    %12 = vector.load %arg9[%c9, %c0_12, %c0_13] : memref<10x10x4xbf16, #tpu.memory_space<vmem>>, vector<1x10x4xbf16>
    tpu.vector_store %arg9[%c9, %c0_12, %c0_13], %11 {strides = array<i32>} : memref<10x10x4xbf16, #tpu.memory_space<vmem>>, vector<1x10x4xbf16>,
    %cst_14 = arith.constant 0.000000e+00 : bf16
    %13 = vector.broadcast %cst_14 : bf16 to vector<8x1x4xbf16>
    %c1 = arith.constant 1 : index
    %c0_15 = arith.constant 0 : index
    %c0_16 = arith.constant 0 : index
    %14 = vector.load %arg9[%c1, %c0_15, %c0_16] : memref<10x10x4xbf16, #tpu.memory_space<vmem>>, vector<8x1x4xbf16>
    tpu.vector_store %arg9[%c1, %c0_15, %c0_16], %13 {strides = array<i32>} : memref<10x10x4xbf16, #tpu.memory_space<vmem>>, vector<8x1x4xbf16>,
    %cst_17 = arith.constant 0.000000e+00 : bf16
    %15 = vector.broadcast %cst_17 : bf16 to vector<8x1x4xbf16>
    %c1_18 = arith.constant 1 : index
    %c9_19 = arith.constant 9 : index
    %c0_20 = arith.constant 0 : index
    %16 = vector.load %arg9[%c1_18, %c9_19, %c0_20] : memref<10x10x4xbf16, #tpu.memory_space<vmem>>, vector<8x1x4xbf16>
    tpu.vector_store %arg9[%c1_18, %c9_19, %c0_20], %15 {strides = array<i32>} : memref<10x10x4xbf16, #tpu.memory_space<vmem>>, vector<8x1x4xbf16>,
    %17 = vector.shape_cast %8 : vector<64x4xf32> to vector<8x8x4xf32>
    %18 = arith.truncf %17 : vector<8x8x4xf32> to vector<8x8x4xbf16>
    %c1_21 = arith.constant 1 : index
    %c1_22 = arith.constant 1 : index
    %c0_23 = arith.constant 0 : index
    %19 = vector.load %arg9[%c1_21, %c1_22, %c0_23] : memref<10x10x4xbf16, #tpu.memory_space<vmem>>, vector<8x8x4xbf16>
    tpu.vector_store %arg9[%c1_21, %c1_22, %c0_23], %18 {strides = array<i32>} : memref<10x10x4xbf16, #tpu.memory_space<vmem>>, vector<8x8x4xbf16>,
    %c0_24 = arith.constant 0 : index
    %c0_25 = arith.constant 0 : index
    %c0_26 = arith.constant 0 : index
    %20 = vector.load %arg9[%c0_24, %c0_25, %c0_26] : memref<10x10x4xbf16, #tpu.memory_space<vmem>>, vector<8x8x4xbf16>
    %21 = vector.shape_cast %20 : vector<8x8x4xbf16> to vector<64x4xbf16>
    %c0_27 = arith.constant 0 : index
    %c0_28 = arith.constant 0 : index
    %c0_29 = arith.constant 0 : index
    %22 = vector.load %arg4[%c0_27, %c0_28, %c0_29] : memref<9x4x4xbf16, #tpu.memory_space<vmem>>, vector<1x4x4xbf16>
    %23 = vector.shape_cast %22 : vector<1x4x4xbf16> to vector<4x4xbf16>
    %cst_30 = arith.constant dense<0.000000e+00> : vector<64x4xf32>
    %24 = tpu.matmul %21, %23, %cst_30 {dimension_numbers = #tpu.dot_dimension_numbers<[1], [0], [0], [1], [0, 0, 1, 1], [], []>} : vector<64x4xbf16>, vector<4x4xbf16>, vector<64x4xf32> -> vector<64x4xf32>
    %c0_31 = arith.constant 0 : index
    %c1_32 = arith.constant 1 : index
    %c0_33 = arith.constant 0 : index
    %25 = vector.load %arg9[%c0_31, %c1_32, %c0_33] : memref<10x10x4xbf16, #tpu.memory_space<vmem>>, vector<8x8x4xbf16>
    %26 = vector.shape_cast %25 : vector<8x8x4xbf16> to vector<64x4xbf16>
    %c1_34 = arith.constant 1 : index
    %c0_35 = arith.constant 0 : index
    %c0_36 = arith.constant 0 : index
    %27 = vector.load %arg4[%c1_34, %c0_35, %c0_36] : memref<9x4x4xbf16, #tpu.memory_space<vmem>>, vector<1x4x4xbf16>
    %28 = vector.shape_cast %27 : vector<1x4x4xbf16> to vector<4x4xbf16>
    %cst_37 = arith.constant dense<0.000000e+00> : vector<64x4xf32>
    %29 = tpu.matmul %26, %28, %cst_37 {dimension_numbers = #tpu.dot_dimension_numbers<[1], [0], [0], [1], [0, 0, 1, 1], [], []>} : vector<64x4xbf16>, vector<4x4xbf16>, vector<64x4xf32> -> vector<64x4xf32>
    %30 = arith.addf %24, %29 : vector<64x4xf32>
    %c0_38 = arith.constant 0 : index
    %c2 = arith.constant 2 : index
    %c0_39 = arith.constant 0 : index
    %31 = vector.load %arg9[%c0_38, %c2, %c0_39] : memref<10x10x4xbf16, #tpu.memory_space<vmem>>, vector<8x8x4xbf16>
    %32 = vector.shape_cast %31 : vector<8x8x4xbf16> to vector<64x4xbf16>
    %c2_40 = arith.constant 2 : index
    %c0_41 = arith.constant 0 : index
    %c0_42 = arith.constant 0 : index
    %33 = vector.load %arg4[%c2_40, %c0_41, %c0_42] : memref<9x4x4xbf16, #tpu.memory_space<vmem>>, vector<1x4x4xbf16>
    %34 = vector.shape_cast %33 : vector<1x4x4xbf16> to vector<4x4xbf16>
    %cst_43 = arith.constant dense<0.000000e+00> : vector<64x4xf32>
    %35 = tpu.matmul %32, %34, %cst_43 {dimension_numbers = #tpu.dot_dimension_numbers<[1], [0], [0], [1], [0, 0, 1, 1], [], []>} : vector<64x4xbf16>, vector<4x4xbf16>, vector<64x4xf32> -> vector<64x4xf32>
    %36 = arith.addf %30, %35 : vector<64x4xf32>
    %c1_44 = arith.constant 1 : index
    %c0_45 = arith.constant 0 : index
    %c0_46 = arith.constant 0 : index
    %37 = vector.load %arg9[%c1_44, %c0_45, %c0_46] : memref<10x10x4xbf16, #tpu.memory_space<vmem>>, vector<8x8x4xbf16>
    %38 = vector.shape_cast %37 : vector<8x8x4xbf16> to vector<64x4xbf16>
    %c3 = arith.constant 3 : index
    %c0_47 = arith.constant 0 : index
    %c0_48 = arith.constant 0 : index
    %39 = vector.load %arg4[%c3, %c0_47, %c0_48] : memref<9x4x4xbf16, #tpu.memory_space<vmem>>, vector<1x4x4xbf16>
    %40 = vector.shape_cast %39 : vector<1x4x4xbf16> to vector<4x4xbf16>
    %cst_49 = arith.constant dense<0.000000e+00> : vector<64x4xf32>
    %41 = tpu.matmul %38, %40, %cst_49 {dimension_numbers = #tpu.dot_dimension_numbers<[1], [0], [0], [1], [0, 0, 1, 1], [], []>} : vector<64x4xbf16>, vector<4x4xbf16>, vector<64x4xf32> -> vector<64x4xf32>
    %42 = arith.addf %36, %41 : vector<64x4xf32>
    %c1_50 = arith.constant 1 : index
    %c1_51 = arith.constant 1 : index
    %c0_52 = arith.constant 0 : index
    %43 = vector.load %arg9[%c1_50, %c1_51, %c0_52] : memref<10x10x4xbf16, #tpu.memory_space<vmem>>, vector<8x8x4xbf16>
    %44 = vector.shape_cast %43 : vector<8x8x4xbf16> to vector<64x4xbf16>
    %c4 = arith.constant 4 : index
    %c0_53 = arith.constant 0 : index
    %c0_54 = arith.constant 0 : index
    %45 = vector.load %arg4[%c4, %c0_53, %c0_54] : memref<9x4x4xbf16, #tpu.memory_space<vmem>>, vector<1x4x4xbf16>
    %46 = vector.shape_cast %45 : vector<1x4x4xbf16> to vector<4x4xbf16>
    %cst_55 = arith.constant dense<0.000000e+00> : vector<64x4xf32>
    %47 = tpu.matmul %44, %46, %cst_55 {dimension_numbers = #tpu.dot_dimension_numbers<[1], [0], [0], [1], [0, 0, 1, 1], [], []>} : vector<64x4xbf16>, vector<4x4xbf16>, vector<64x4xf32> -> vector<64x4xf32>
    %48 = arith.addf %42, %47 : vector<64x4xf32>
    %c1_56 = arith.constant 1 : index
    %c2_57 = arith.constant 2 : index
    %c0_58 = arith.constant 0 : index
    %49 = vector.load %arg9[%c1_56, %c2_57, %c0_58] : memref<10x10x4xbf16, #tpu.memory_space<vmem>>, vector<8x8x4xbf16>
    %50 = vector.shape_cast %49 : vector<8x8x4xbf16> to vector<64x4xbf16>
    %c5 = arith.constant 5 : index
    %c0_59 = arith.constant 0 : index
    %c0_60 = arith.constant 0 : index
    %51 = vector.load %arg4[%c5, %c0_59, %c0_60] : memref<9x4x4xbf16, #tpu.memory_space<vmem>>, vector<1x4x4xbf16>
    %52 = vector.shape_cast %51 : vector<1x4x4xbf16> to vector<4x4xbf16>
    %cst_61 = arith.constant dense<0.000000e+00> : vector<64x4xf32>
    %53 = tpu.matmul %50, %52, %cst_61 {dimension_numbers = #tpu.dot_dimension_numbers<[1], [0], [0], [1], [0, 0, 1, 1], [], []>} : vector<64x4xbf16>, vector<4x4xbf16>, vector<64x4xf32> -> vector<64x4xf32>
    %54 = arith.addf %48, %53 : vector<64x4xf32>
    %c2_62 = arith.constant 2 : index
    %c0_63 = arith.constant 0 : index
    %c0_64 = arith.constant 0 : index
    %55 = vector.load %arg9[%c2_62, %c0_63, %c0_64] : memref<10x10x4xbf16, #tpu.memory_space<vmem>>, vector<8x8x4xbf16>
    %56 = vector.shape_cast %55 : vector<8x8x4xbf16> to vector<64x4xbf16>
    %c6 = arith.constant 6 : index
    %c0_65 = arith.constant 0 : index
    %c0_66 = arith.constant 0 : index
    %57 = vector.load %arg4[%c6, %c0_65, %c0_66] : memref<9x4x4xbf16, #tpu.memory_space<vmem>>, vector<1x4x4xbf16>
    %58 = vector.shape_cast %57 : vector<1x4x4xbf16> to vector<4x4xbf16>
    %cst_67 = arith.constant dense<0.000000e+00> : vector<64x4xf32>
    %59 = tpu.matmul %56, %58, %cst_67 {dimension_numbers = #tpu.dot_dimension_numbers<[1], [0], [0], [1], [0, 0, 1, 1], [], []>} : vector<64x4xbf16>, vector<4x4xbf16>, vector<64x4xf32> -> vector<64x4xf32>
    %60 = arith.addf %54, %59 : vector<64x4xf32>
    %c2_68 = arith.constant 2 : index
    %c1_69 = arith.constant 1 : index
    %c0_70 = arith.constant 0 : index
    %61 = vector.load %arg9[%c2_68, %c1_69, %c0_70] : memref<10x10x4xbf16, #tpu.memory_space<vmem>>, vector<8x8x4xbf16>
    %62 = vector.shape_cast %61 : vector<8x8x4xbf16> to vector<64x4xbf16>
    %c7 = arith.constant 7 : index
    %c0_71 = arith.constant 0 : index
    %c0_72 = arith.constant 0 : index
    %63 = vector.load %arg4[%c7, %c0_71, %c0_72] : memref<9x4x4xbf16, #tpu.memory_space<vmem>>, vector<1x4x4xbf16>
    %64 = vector.shape_cast %63 : vector<1x4x4xbf16> to vector<4x4xbf16>
    %cst_73 = arith.constant dense<0.000000e+00> : vector<64x4xf32>
    %65 = tpu.matmul %62, %64, %cst_73 {dimension_numbers = #tpu.dot_dimension_numbers<[1], [0], [0], [1], [0, 0, 1, 1], [], []>} : vector<64x4xbf16>, vector<4x4xbf16>, vector<64x4xf32> -> vector<64x4xf32>
    %66 = arith.addf %60, %65 : vector<64x4xf32>
    %c2_74 = arith.constant 2 : index
    %c2_75 = arith.constant 2 : index
    %c0_76 = arith.constant 0 : index
    %67 = vector.load %arg9[%c2_74, %c2_75, %c0_76] : memref<10x10x4xbf16, #tpu.memory_space<vmem>>, vector<8x8x4xbf16>
    %68 = vector.shape_cast %67 : vector<8x8x4xbf16> to vector<64x4xbf16>
    %c8 = arith.constant 8 : index
    %c0_77 = arith.constant 0 : index
    %c0_78 = arith.constant 0 : index
    %69 = vector.load %arg4[%c8, %c0_77, %c0_78] : memref<9x4x4xbf16, #tpu.memory_space<vmem>>, vector<1x4x4xbf16>
    %70 = vector.shape_cast %69 : vector<1x4x4xbf16> to vector<4x4xbf16>
    %cst_79 = arith.constant dense<0.000000e+00> : vector<64x4xf32>
    %71 = tpu.matmul %68, %70, %cst_79 {dimension_numbers = #tpu.dot_dimension_numbers<[1], [0], [0], [1], [0, 0, 1, 1], [], []>} : vector<64x4xbf16>, vector<4x4xbf16>, vector<64x4xf32> -> vector<64x4xf32>
    %72 = arith.addf %66, %71 : vector<64x4xf32>
    %c0_80 = arith.constant 0 : index
    %c0_81 = arith.constant 0 : index
    %73 = vector.load %arg5[%c0_80, %c0_81] : memref<1x4xf32, #tpu.memory_space<vmem>>, vector<1x4xf32>
    %74 = vector.broadcast %73 : vector<1x4xf32> to vector<64x4xf32>
    %75 = arith.addf %72, %74 : vector<64x4xf32>
    %cst_82 = arith.constant 0.000000e+00 : f32
    %76 = vector.broadcast %cst_82 : f32 to vector<64x4xf32>
    %77 = arith.maximumf %75, %76 : vector<64x4xf32>
    %78 = arith.truncf %77 : vector<64x4xf32> to vector<64x4xbf16>
    %c0_83 = arith.constant 0 : index
    %c0_84 = arith.constant 0 : index
    %79 = vector.load %arg6[%c0_83, %c0_84] : memref<4x16xbf16, #tpu.memory_space<vmem>>, vector<4x16xbf16>
    %cst_85 = arith.constant dense<0.000000e+00> : vector<64x16xf32>
    %80 = tpu.matmul %78, %79, %cst_85 {dimension_numbers = #tpu.dot_dimension_numbers<[1], [0], [0], [1], [0, 0, 1, 1], [], []>} : vector<64x4xbf16>, vector<4x16xbf16>, vector<64x16xf32> -> vector<64x16xf32>
    %c0_86 = arith.constant 0 : index
    %c0_87 = arith.constant 0 : index
    %81 = vector.load %arg7[%c0_86, %c0_87] : memref<1x16xf32, #tpu.memory_space<vmem>>, vector<1x16xf32>
    %82 = vector.broadcast %81 : vector<1x16xf32> to vector<64x16xf32>
    %83 = arith.addf %80, %82 : vector<64x16xf32>
    %84 = arith.extf %1 : vector<64x16xbf16> to vector<64x16xf32>
    %85 = arith.addf %83, %84 : vector<64x16xf32>
    %cst_88 = arith.constant 0.000000e+00 : f32
    %86 = vector.broadcast %cst_88 : f32 to vector<64x16xf32>
    %87 = arith.maximumf %85, %86 : vector<64x16xf32>
    %88 = arith.truncf %87 : vector<64x16xf32> to vector<64x16xbf16>
    %c0_89 = arith.constant 0 : index
    %c0_90 = arith.constant 0 : index
    %c0_91 = arith.constant 0 : index
    %89 = vector.load %arg8[%c0_89, %c0_90, %c0_91] : memref<1x64x16xbf16, #tpu.memory_space<vmem>>, vector<1x64x16xbf16>
    %90 = vector.shape_cast %89 : vector<1x64x16xbf16> to vector<64x16xbf16>
    %91 = vector.shape_cast %88 : vector<64x16xbf16> to vector<1x64x16xbf16>
    tpu.vector_store %arg8[%c0_89, %c0_90, %c0_91], %91 {strides = array<i32>} : memref<1x64x16xbf16, #tpu.memory_space<vmem>>, vector<1x64x16xbf16>,
    return
  }
  func.func @transform_0(%arg0: i32) -> (i32, i32, i32) {
    %c0_i32 = arith.constant 0 : i32
    %c0_i32_0 = arith.constant 0 : i32
    %c0_i32_1 = arith.constant 0 : i32
    return %arg0, %c0_i32, %c0_i32_0 : i32, i32, i32
  }
  func.func @transform_1(%arg0: i32) -> (i32, i32) {
    %c0_i32 = arith.constant 0 : i32
    %c0_i32_0 = arith.constant 0 : i32
    %c0_i32_1 = arith.constant 0 : i32
    return %c0_i32, %c0_i32_0 : i32, i32
  }
  func.func @transform_2(%arg0: i32) -> (i32, i32) {
    %c0_i32 = arith.constant 0 : i32
    %c0_i32_0 = arith.constant 0 : i32
    %c0_i32_1 = arith.constant 0 : i32
    return %c0_i32, %c0_i32_0 : i32, i32
  }
  func.func @transform_3(%arg0: i32) -> (i32, i32, i32) {
    %c0_i32 = arith.constant 0 : i32
    %c0_i32_0 = arith.constant 0 : i32
    %c0_i32_1 = arith.constant 0 : i32
    %c0_i32_2 = arith.constant 0 : i32
    return %c0_i32, %c0_i32_0, %c0_i32_1 : i32, i32, i32
  }
  func.func @transform_4(%arg0: i32) -> (i32, i32) {
    %c0_i32 = arith.constant 0 : i32
    %c0_i32_0 = arith.constant 0 : i32
    %c0_i32_1 = arith.constant 0 : i32
    return %c0_i32, %c0_i32_0 : i32, i32
  }
  func.func @transform_5(%arg0: i32) -> (i32, i32) {
    %c0_i32 = arith.constant 0 : i32
    %c0_i32_0 = arith.constant 0 : i32
    %c0_i32_1 = arith.constant 0 : i32
    return %c0_i32, %c0_i32_0 : i32, i32
  }
  func.func @transform_6(%arg0: i32) -> (i32, i32) {
    %c0_i32 = arith.constant 0 : i32
    %c0_i32_0 = arith.constant 0 : i32
    %c0_i32_1 = arith.constant 0 : i32
    return %c0_i32, %c0_i32_0 : i32, i32
  }
  func.func @transform_7(%arg0: i32) -> (i32, i32, i32) {
    %c0_i32 = arith.constant 0 : i32
    %c0_i32_0 = arith.constant 0 : i32
    %c0_i32_1 = arith.constant 0 : i32
    return %arg0, %c0_i32, %c0_i32_0 : i32, i32, i32
  }
}

</mosaic_0001>

<bundles_post_ra>
// kernel: bottleneck_forward.1
= control target key start
LH: loop header
LB: loop body
LE: loop exit
PB: predicated region body
PF: predicated region fallthrough
CT: control target
= control target key end

     0   :  { %s2859_s24 = smov 0   ;;  %s3415_s0 = inlined_call_operand.vmem [shape: bf16[2,64,16], index: 0, kind: input, shape index: {}]   ;;  %s3416_s1 = inlined_call_operand.vmem [shape: bf16[16,4], index: 1, kind: input, shape index: {}]   ;;  %s3417_s2 = inlined_call_operand.vmem [shape: f32[1,4], index: 2, kind: input, shape index: {}]   ;;  %s3418_s3 = inlined_call_operand.vmem [shape: bf16[9,4,4], index: 3, kind: input, shape index: {}]   ;;  %s3419_s4 = inlined_call_operand.vmem [shape: f32[1,4], index: 4, kind: input, shape index: {}]   ;;  %s3420_s5 = inlined_call_operand.vmem [shape: bf16[4,16], index: 5, kind: input, shape index: {}]   ;;  %s3421_s6 = inlined_call_operand.vmem [shape: f32[1,16], index: 6, kind: input, shape index: {}]   ;;  %s3422_s7 = inlined_call_operand.vmem [shape: bf16[2,64,16], index: 7, kind: output, shape index: {}]  }
   0x1 LB: > { %s2369_s25 = sadd.s32 4294967295, %s2816_s24   ;;  %p2373_p0 = scmp.ge.s32.totalorder %s2816_s24, 1  ;;  %s2816_s24 = sphi %s2859_s24, %s17_s24  }
   0x2   : > { %p237_p1 = scmp.lt.s32.totalorder %s2816_s24, 3 }
   0x4   : > { %p238_p2 = pnand %p2373_p0, %p237_p1 }
   0x5   : > { %v2785_v0 = vld [vmem:[%s3416_s1] sm:$0xff] (!%p238_p2)   ;;  %p269_p3 = scmp.lt.s32.totalorder (!%p238_p2), %s2369_s25, 1  ;;  %vm323_vm0 = vcmask (!%p238_p2), 130048   ;;  %vm411_vm1 = vcmask (!%p238_p2), 24576   ;;  %vm418_vm2 = vsmask.f32 (!%p238_p2), 256 }
   0x6   : > { %241 = sbr.rel (%p238_p2) target bundleno = 812 (0x32c), region = 48  ;;  %2589 = vmatprep.subr.bf16.mxu0 (!%p238_p2), %v2785_v0  ;;  %vm444_vm3 = vsmask.f32 (!%p238_p2), 7938  ;;  %vm409_vm4 = vcmask (!%p238_p2), 27648   ;;  %vm2884_vm5 = vmand (!%p238_p2), %vm411_vm1, %vm418_vm2  ;;  %v426_v6 = vld [vmem:[#allocation2 + $0x18] sm:$0x1] (!%p238_p2) }
   0x7   : > { %2590 = vmatpush3.bf16.msra.mxu0 (!%p238_p2), %v2785_v0  ;;  %v452_v7 = vld [vmem:[#allocation2 + $0x1c] sm:$0x1] (!%p238_p2)  ;;  %v2818_v8 = vmov (!%p238_p2), 0   ;;  %v427_v9 = vsel (!%p238_p2), %vm2884_vm5, 0, %v426_v6  ;;  %vm2893_vm6 = vmand (!%p238_p2), %vm411_vm1, %vm444_vm3  ;;  %v420_v11 = vld [vmem:[#allocation2 + $0x8] sm:$0x1] (!%p238_p2) }
   0x8   : > { %410 = vst.msk [vmem:[#allocation2] sm:$0xf] (!%p238_p2), %vm409_vm4, %v2818_v8  ;;  %414 = vst.msk [vmem:[#allocation2 + $0x48] sm:$0xf] (!%p238_p2), %vm409_vm4, %v2818_v8  ;;  %v446_v12 = vld [vmem:[#allocation2 + $0xc] sm:$0x1] (!%p238_p2) }
   0x9   : > { %412 = vst.msk [vmem:[#allocation2 + $0x4] sm:$0x1] (!%p238_p2), %vm411_vm1, %v2818_v8  ;;  %415 = vst.msk [vmem:[#allocation2 + $0x4c] sm:$0x1] (!%p238_p2), %vm411_vm1, %v2818_v8  ;;  %v453_v13 = vsel (!%p238_p2), %vm2893_vm6, 0, %v452_v7  ;;  %v421_v14 = vsel (!%p238_p2), %vm2884_vm5, 0, %v420_v11 }
   0xa   : > { %428 = vst [vmem:[#allocation2 + $0x18] sm:$0x1] (!%p238_p2), %v427_v9  ;;  %v447_v15 = vsel (!%p238_p2), %vm2893_vm6, 0, %v446_v12  ;;  %v429_v16 = vld [vmem:[#allocation2 + $0x20] sm:$0x1] (!%p238_p2)  ;;  %vm2913_vm7 = vmand (!%p238_p2), %vm409_vm4, %vm444_vm3  ;;  %vm791_vm8 = vcmask (!%p238_p2), 1041408  }
   0xb   : > { %454 = vst [vmem:[#allocation2 + $0x1c] sm:$0x1] (!%p238_p2), %v453_v13  ;;  %422 = vst [vmem:[#allocation2 + $0x8] sm:$0x1] (!%p238_p2), %v421_v14  ;;  %v430_v17 = vsel (!%p238_p2), %vm2884_vm5, 0, %v429_v16  ;;  %vm778_vm11 = vcmask (!%p238_p2), 31744  }
   0xc   : > { %448 = vst [vmem:[#allocation2 + $0xc] sm:$0x1] (!%p238_p2), %v447_v15  ;;  %v455_v18 = vld [vmem:[#allocation2 + $0x24] sm:$0x1] (!%p238_p2)  ;;  %v423_v19 = vld [vmem:[#allocation2 + $0x10] sm:$0x1] (!%p238_p2) }
   0xd   : > { %s3434_s25 = smov (!%p269_p3, %s2369_s25), 1  ;;  %431 = vst [vmem:[#allocation2 + $0x20] sm:$0x1] %v430_v17  ;;  %v456_v20 = vsel %vm2893_vm6, 0, %v455_v18  ;;  %v424_v21 = vsel %vm2884_vm5, 0, %v423_v19  ;;  %vm984_vm13 = vcmask 1042432  }
   0xe   : > { %s2516_s28 = sshll.u32 %s3434_s25, 5  ;;  %v449_v22 = vld [vmem:[#allocation2 + $0x14] sm:$0x1]  ;;  %457 = vst [vmem:[#allocation2 + $0x24] sm:$0x1] %v456_v20  ;;  %vm985_vm14 = vcmask 1046532  }
   0xf   : > { %s2878_s8 = scalar_lea.vmem %s3415_s0, %s2516_s28  ;;  %425 = vst [vmem:[#allocation2 + $0x10] sm:$0x1] %v424_v21  ;;  %v450_v23 = vsel %vm2893_vm6, 0, %v449_v22  ;;  %v438_v25 = vld [vmem:[#allocation2 + $0x38] sm:$0x1]  ;;  %vm3202_vm15 = vmor %vm984_vm13, %vm985_vm14  ;;  %s3392_s18 = scalar_lea.vmem %s3422_s7, %s2516_s28 }
  0x10   : > { %v280_v1 = vld [vmem:[%s2878_s8] sm:$0xff]   ;;  %v282_v2 = vld [vmem:[%s2878_s8 + $0x8] sm:$0xff]   ;;  %v284_v3 = vld [vmem:[%s2878_s8 + $0x10] sm:$0xff]   ;;  %451 = vst [vmem:[#allocation2 + $0x14] sm:$0x1] %v450_v23  ;;  %v439_v27 = vsel %vm2884_vm5, 0, %v438_v25 }
  0x11   : > { %2591 = vmatprep.mubr.msk.bf16.mxu0 %vm323_vm0, %v280_v1  ;;  %v286_v4 = vld [vmem:[%s2878_s8 + $0x18] sm:$0xff]   ;;  %440 = vst [vmem:[#allocation2 + $0x38] sm:$0x1] %v439_v27  ;;  %v432_v29 = vld [vmem:[#allocation2 + $0x28] sm:$0x1] }
  0x12   : > { %2592 = vmatmul.mubr.msk.bf16.vlgmr.msra.gmra.mrb[0].mxu0 %vm323_vm0, %v282_v2  ;;  %v464_v26 = vld [vmem:[#allocation2 + $0x3c] sm:$0x1]  ;;  %v458_v30 = vld [vmem:[#allocation2 + $0x2c] sm:$0x1]  ;;  %v433_v31 = vsel %vm2884_vm5, 0, %v432_v29 }
  0x13   : > { %2595 = vmatprep.mubr.msk.bf16.mxu0 %vm323_vm0, %v284_v3  ;;  %v465_v28 = vsel %vm2893_vm6, 0, %v464_v26  ;;  %v459_v32 = vsel %vm2893_vm6, 0, %v458_v30  ;;  %434 = vst [vmem:[#allocation2 + $0x28] sm:$0x1] %v433_v31  ;;  %v441_v33 = vld [vmem:[#allocation2 + $0x40] sm:$0x1] }
  0x14   : > { %466 = vst [vmem:[#allocation2 + $0x3c] sm:$0x1] %v465_v28  ;;  %460 = vst [vmem:[#allocation2 + $0x2c] sm:$0x1] %v459_v32  ;;  %v467_v34 = vld [vmem:[#allocation2 + $0x44] sm:$0x1] }
  0x15   : > { %v442_v35 = vsel %vm2884_vm5, 0, %v441_v33  ;;  %v468_v36 = vsel %vm2893_vm6, 0, %v467_v34  ;;  %v435_v37 = vld [vmem:[#allocation2 + $0x30] sm:$0x1]  ;;  %v461_v38 = vld [vmem:[#allocation2 + $0x34] sm:$0x1] }
  0x16   : > { %443 = vst [vmem:[#allocation2 + $0x40] sm:$0x1] %v442_v35  ;;  %469 = vst [vmem:[#allocation2 + $0x44] sm:$0x1] %v468_v36  ;;  %v436_v39 = vsel %vm2884_vm5, 0, %v435_v37  ;;  %v462_v40 = vsel %vm2893_vm6, 0, %v461_v38 }
  0x17   : > { %437 = vst [vmem:[#allocation2 + $0x30] sm:$0x1] %v436_v39  ;;  %463 = vst [vmem:[#allocation2 + $0x34] sm:$0x1] %v462_v40  ;;  %v2936_v41 = vld [vmem:[%s3418_s3 + $0x6] sm:$0x3] }
  0x18   : > { %v2396_v42 = vld [vmem:[%s3418_s3 + $0x2] sm:$0x3]  ;;  %2769 = vmatprep.subr.msk.bf16.mxu1 %vm791_vm8, %v2936_v41  ;;  %v2946_v43 = vsel %vm791_vm8, %v2936_v41, 0  ;;  %v2953_v45 = vld [vmem:[%s3418_s3 + $0x8] sm:$0x3] }
  0x19   : > { %2765 = vmatprep.subr.msk.bf16.mxu0 %vm791_vm8, %v2396_v42  ;;  %v793_v44 = vsel %vm791_vm8, %v2396_v42, 0  ;;  %2700 = vmatpush3.bf16.msra.mxu1 %v2946_v43  ;;  %v2960_v46 = vld [vmem:[%s3418_s3] sm:$0x3]  ;;  %v2981_v3 = vld [vmem:[#allocation2 + $0x4] sm:$0x1] }
  0x1a   : > { %2596 = vmatmul.mubr.msk.bf16.gmra.mrb[4].mxu0 %vm323_vm0, %v286_v4  ;;  %2770 = vmatprep.subr.msk.bf16.mxu1 %vm791_vm8, %v2953_v45  ;;  %v2964_v47 = vld [vmem:[#allocation2] sm:$0xf]  ;;  %v662_v8 = vshll.u32 %v2981_v3, 16  ;;  %v596_v10 = vld [vmem:[#allocation2 + $0x18] sm:$0xf]  ;;  %vm2305_vm0 = vcmask 125952  }
  0x1b   : > { %2600 = vmatpush3.bf16.msra.mxu0 %v793_v44  ;;  %v2969_v48 = vld [vmem:[%s3417_s2] ss:$0 sm:$0xff]  ;;  %v653_v49 = vshrl.u32 %v2964_v47, 16  ;;  %v656_v50 = vshll.u32 %v2964_v47, 16  ;;  %v599_v11 = vld [vmem:[#allocation2 + $0x1c] sm:$0x1] }
  0x1c   : > { %2766 = vmatprep.subr.msk.bf16.mxu0 %vm791_vm8, %v2960_v46  ;;  %v584_v17 = vld [vmem:[#allocation2 + $0x8] sm:$0xf]  ;;  %v587_v23 = vld [vmem:[#allocation2 + $0xc] sm:$0x1]  ;;  %v602_v32 = vld [vmem:[#allocation2 + $0x20] sm:$0xf] }
  0x1d   : > { %v2976_v59 = vrot.slane %v653_v49, 4  ;;  %v2978_v60 = vrot.slane %v656_v50, 5  ;;  %v605_v37 = vld [vmem:[#allocation2 + $0x24] sm:$0x1]  ;;  %v590_v50 = vld [vmem:[#allocation2 + $0x10] sm:$0xf] }
  0x1e   : > { %vm649_vm9 = vsmask.f32 3328  ;;  %vm650_vm10 = vsmask.f32 7440 }
  0x1f   : > { %v659_v7 = vor.u32 %v2978_v60, %v2976_v59  ;;  %vm3066_vm12 = vmor %vm649_vm9, %vm650_vm10 }
  0xe5   : > { %v2593_v51 = vpop.f32.mrb[0].mxu0 }
  0xe6   : > { %v379_v52 = vadd.f32 %v2593_v51, %v2969_v48  ;;  %v370_v53 = vpop.f32.mrb[1].mxu0  ;;  %v593_v51 = vld [vmem:[#allocation2 + $0x14] sm:$0x1] }
  0xe7   : > { %v371_v54 = vadd.f32 %v2969_v48, %v370_v53  ;;  %v2594_v55 = vpop.f32.mrb[2].mxu0 }
  0xe8   : > { %v403_v56 = vmax.f32 %v379_v52, 0.0  ;;  %v382_v57 = vadd.f32 %v2594_v55, %v2969_v48  ;;  %v373_v58 = vpop.f32.mrb[3].mxu0 }
  0xe9   : > { %v401_v61 = vmax.f32 %v371_v54, 0.0  ;;  %v374_v62 = vadd.f32 %v2969_v48, %v373_v58 }
  0xea   : > { %v2520_v63 = vpack.c.bf16 %v403_v56, %v403_v56  ;;  %v404_v0 = vmax.f32 %v382_v57, 0.0 }
  0xeb   : > { %v2518_v1 = vpack.c.bf16 %v401_v61, %v401_v61  ;;  %v402_v2 = vmax.f32 %v374_v62, 0.0 }
  0xec   : > { %v519_v4 = vshrl.u32 %v2520_v63, 16  ;;  %v2521_v6 = vpack.c.bf16 %v404_v0, %v404_v0  ;;  %v522_v9 = vshll.u32 %v2520_v63, 16 }
  0xed   : > { %v503_v12 = vshrl.u32 %v2518_v1, 16  ;;  %v506_v13 = vshll.u32 %v2518_v1, 16  ;;  %v2519_v14 = vpack.c.bf16 %v402_v2, %v402_v2  ;;  %v2597_v15 = vpop.f32.mrb[4].mxu0 }
  0xee   : > { %v521_v16 = vrot.slane %v519_v4, 7  ;;  %v527_v18 = vshrl.u32 %v2521_v6, 16  ;;  %v530_v19 = vshll.u32 %v2521_v6, 16  ;;  %v395_v20 = vadd.f32 %v2597_v15, %v2969_v48  ;;  %v386_v21 = vpop.f32.mrb[5].mxu0  ;;  %v3009_v6 = vld [vmem:[%s3418_s3 + $0xa] sm:$0x3] }
  0xef   : > { %v505_v22 = vrot.slane %v503_v12, 7  ;;  %v511_v25 = vshrl.u32 %v2519_v14, 16  ;;  %v514_v26 = vshll.u32 %v2519_v14, 16  ;;  %v387_v27 = vadd.f32 %v2969_v48, %v386_v21  ;;  %v2598_v28 = vpop.f32.mrb[6].mxu0  ;;  %v623_v15 = vld [vmem:[#allocation2 + $0x3c] sm:$0x1] }
  0xf0   : > { %v524_v29 = vor.u32 %v522_v9, %v521_v16  ;;  %v525_v30 = vrot.slane %v521_v16, 4  ;;  %v529_v31 = vrot.slane %v527_v18, 7  ;;  %v407_v33 = vmax.f32 %v395_v20, 0.0  ;;  %v389_v34 = vpop.f32.mrb[7].mxu0  ;;  %v620_v9 = vld [vmem:[#allocation2 + $0x38] sm:$0xf] }
  0xf1   : > { %v508_v35 = vor.u32 %v506_v13, %v505_v22  ;;  %v509_v36 = vrot.slane %v505_v22, 4  ;;  %v513_v38 = vrot.slane %v511_v25, 7  ;;  %v405_v39 = vmax.f32 %v387_v27, 0.0  ;;  %v608_v18 = vld [vmem:[#allocation2 + $0x28] sm:$0xf] }
  0xf2   : > { %v597_v40 = vsel %vm2913_vm7, %v524_v29, %v596_v10  ;;  %v600_v42 = vsel %vm2884_vm5, %v525_v30, %v599_v11  ;;  %v532_v44 = vor.u32 %v530_v19, %v529_v31  ;;  %v533_v49 = vrot.slane %v529_v31, 4  ;;  %v611_v19 = vld [vmem:[#allocation2 + $0x2c] sm:$0x1] }
  0xf3   : > { %598 = vst [vmem:[#allocation2 + $0x18] sm:$0xf] %v597_v40  ;;  %601 = vst [vmem:[#allocation2 + $0x1c] sm:$0x1] %v600_v42  ;;  %v585_v52 = vsel %vm2913_vm7, %v508_v35, %v584_v17  ;;  %v588_v53 = vsel %vm2884_vm5, %v509_v36, %v587_v23  ;;  %v516_v54 = vor.u32 %v514_v26, %v513_v38  ;;  %v517_v55 = vrot.slane %v513_v38, 4 }
  0xf4   : > { %586 = vst [vmem:[#allocation2 + $0x8] sm:$0xf] %v585_v52  ;;  %589 = vst [vmem:[#allocation2 + $0xc] sm:$0x1] %v588_v53  ;;  %v603_v56 = vsel %vm2913_vm7, %v532_v44, %v602_v32  ;;  %v606_v57 = vsel %vm2884_vm5, %v533_v49, %v605_v37  ;;  %v2524_v58 = vpack.c.bf16 %v407_v33, %v407_v33  ;;  %v3014_v12 = vrot.slane %v659_v7, 4 }
  0xf5   : > { %v2522_v61 = vpack.c.bf16 %v405_v39, %v405_v39  ;;  %604 = vst [vmem:[#allocation2 + $0x20] sm:$0xf] %v603_v56  ;;  %607 = vst [vmem:[#allocation2 + $0x24] sm:$0x1] %v606_v57  ;;  %v591_v62 = vsel %vm2913_vm7, %v516_v54, %v590_v50  ;;  %v594_v63 = vsel %vm2884_vm5, %v517_v55, %v593_v51  ;;  %v3022_v22 = vsel %vm791_vm8, %v2953_v45, 0 }
  0xf6   : > { %v398_v0 = vadd.f32 %v2598_v28, %v2969_v48  ;;  %v390_v1 = vadd.f32 %v2969_v48, %v389_v34  ;;  %592 = vst [vmem:[#allocation2 + $0x10] sm:$0xf] %v591_v62  ;;  %595 = vst [vmem:[#allocation2 + $0x14] sm:$0x1] %v594_v63  ;;  %v551_v2 = vshrl.u32 %v2524_v58, 16  ;;  %v3018_v48 = vrot.slane %v662_v8, 5 }
  0xf7   : > { %v535_v4 = vshrl.u32 %v2522_v61, 16  ;;  %v554_v14 = vshll.u32 %v2524_v58, 16  ;;  %v538_v17 = vshll.u32 %v2522_v61, 16  ;;  %v3026_v59 = vsel %vm791_vm8, %v3009_v6, 0  ;;  %v626_v34 = vld [vmem:[#allocation2 + $0x40] sm:$0xf] }
  0xf8   : > { %v408_v10 = vmax.f32 %v398_v0, 0.0  ;;  %v406_v11 = vmax.f32 %v390_v1, 0.0  ;;  %v553_v13 = vrot.slane %v551_v2, 7  ;;  %v629_v35 = vld [vmem:[#allocation2 + $0x44] sm:$0x1]  ;;  %v3054_v1 = vsel %vm791_vm8, %v2960_v46, 0 }
  0xf9   : > { %v537_v16 = vrot.slane %v535_v4, 7  ;;  %v614_v36 = vld [vmem:[#allocation2 + $0x30] sm:$0xf]  ;;  %v617_v49 = vld [vmem:[#allocation2 + $0x34] sm:$0x1] }
  0xfa   : > { %v2525_v20 = vpack.c.bf16 %v408_v10, %v408_v10  ;;  %v2523_v21 = vpack.c.bf16 %v406_v11, %v406_v11  ;;  %v556_v60 = vor.u32 %v554_v14, %v553_v13  ;;  %v557_v7 = vrot.slane %v553_v13, 4  ;;  %v3028_v25 = vld [vmem:[#allocation2 + $0x18] sm:$0xf]  ;;  %v3070_v46 = vld [vmem:[#allocation2 + $0x1c] sm:$0x1] }
  0xfb   : > { %v540_v8 = vor.u32 %v538_v17, %v537_v16  ;;  %v541_v23 = vrot.slane %v537_v16, 4  ;;  %v3030_v30 = vld [vmem:[#allocation2 + $0x8] sm:$0xf]  ;;  %v3040_v37 = vld [vmem:[#allocation2 + $0xc] sm:$0x1]  ;;  %v695_v53 = vshrl.u32 %v3028_v25, 16 }
  0xfc   : > { %v559_v26 = vshrl.u32 %v2525_v20, 16  ;;  %v562_v27 = vshll.u32 %v2525_v20, 16  ;;  %v543_v28 = vshrl.u32 %v2523_v21, 16  ;;  %v546_v29 = vshll.u32 %v2523_v21, 16  ;;  %v1239_v0 = vld [vmem:[#allocation2 + $0x8] sm:$0xf] }
  0xfd   : > { %v621_v45 = vsel %vm2913_vm7, %v556_v60, %v620_v9  ;;  %v624_v31 = vsel %vm2884_vm5, %v557_v7, %v623_v15  ;;  %v609_v32 = vsel %vm2913_vm7, %v540_v8, %v608_v18  ;;  %v612_v33 = vsel %vm2884_vm5, %v541_v23, %v611_v19  ;;  %v3044_v44 = vld [vmem:[#allocation2 + $0x10] sm:$0xf]  ;;  %v3050_v58 = vld [vmem:[#allocation2 + $0x14] sm:$0x1]  ;;  %v3073_v16 = vld [vmem:[#allocation2 + $0xc] sm:$0x1] }
  0xfe   : > { %622 = vst [vmem:[#allocation2 + $0x38] sm:$0xf] %v621_v45  ;;  %625 = vst [vmem:[#allocation2 + $0x3c] sm:$0x1] %v624_v31  ;;  %v561_v38 = vrot.slane %v559_v26, 7  ;;  %v545_v39 = vrot.slane %v543_v28, 7  ;;  %v665_v21 = vsel %vm3066_vm12, %v3014_v12, %v3018_v48 }
  0xff   : > { %610 = vst [vmem:[#allocation2 + $0x28] sm:$0xf] %v609_v32  ;;  %613 = vst [vmem:[#allocation2 + $0x2c] sm:$0x1] %v612_v33  ;;  %v667_v40 = vshrl.u32 %v3030_v30, 16  ;;  %v670_v42 = vshll.u32 %v3030_v30, 16 }
 0x100   : > { %v676_v50 = vshll.u32 %v3040_v37, 16  ;;  %v681_v51 = vshrl.u32 %v3044_v44, 16  ;;  %v684_v52 = vshll.u32 %v3044_v44, 16  ;;  %v564_v54 = vor.u32 %v562_v27, %v561_v38  ;;  %v1241_v18 = vld [vmem:[#allocation2 + $0x10] sm:$0xf] }
 0x101   : > { %v565_v55 = vrot.slane %v561_v38, 4  ;;  %v548_v56 = vor.u32 %v546_v29, %v545_v39  ;;  %v549_v57 = vrot.slane %v545_v39, 4  ;;  %v669_v61 = vrot.slane %v667_v40, 4  ;;  %v3083_v31 = vld [vmem:[#allocation2 + $0x14] sm:$0x1] }
 0x102   : > { %v672_v62 = vrot.slane %v670_v42, 5  ;;  %v683_v63 = vrot.slane %v681_v51, 4  ;;  %v627_v2 = vsel %vm2913_vm7, %v564_v54, %v626_v34  ;;  %v678_v14 = vrot.slane %v676_v50, 5  ;;  %v3090_v42 = vld [vmem:[#allocation2 + $0x24] sm:$0x1] }
 0x103   : > { %v630_v4 = vsel %vm2884_vm5, %v565_v55, %v629_v35  ;;  %v615_v9 = vsel %vm2913_vm7, %v548_v56, %v614_v36  ;;  %v618_v10 = vsel %vm2884_vm5, %v549_v57, %v617_v49  ;;  %628 = vst [vmem:[#allocation2 + $0x40] sm:$0xf] %v627_v2  ;;  %v686_v15 = vrot.slane %v684_v52, 5  ;;  %v3086_v36 = vld [vmem:[#allocation2 + $0x20] sm:$0xf] }
 0x104   : > { %631 = vst [vmem:[#allocation2 + $0x44] sm:$0x1] %v630_v4  ;;  %616 = vst [vmem:[#allocation2 + $0x30] sm:$0xf] %v615_v9  ;;  %v673_v13 = vor.u32 %v672_v62, %v669_v61  ;;  %v690_v24 = vshll.u32 %v3050_v58, 16  ;;  %v697_v5 = vrot.slane %v695_v53, 4 }
 0x105   : > { %619 = vst [vmem:[#allocation2 + $0x34] sm:$0x1] %v618_v10  ;;  %v698_v17 = vshll.u32 %v3028_v25, 16  ;;  %v1256_v19 = vshrl.u32 %v1239_v0, 16  ;;  %v1259_v20 = vshll.u32 %v1239_v0, 16  ;;  %v687_v7 = vor.u32 %v686_v15, %v683_v63 }
 0x106   : > { %v674_v60 = vrot.slane %v673_v13, 4  ;;  %v704_v8 = vshll.u32 %v3070_v46, 16  ;;  %v692_v23 = vrot.slane %v690_v24, 5  ;;  %v1265_v32 = vshll.u32 %v3073_v16, 16  ;;  %v3088_v40 = vld [vmem:[#allocation2 + $0x28] sm:$0xf] }
 0x107   : > { %v700_v26 = vrot.slane %v698_v17, 5  ;;  %v1258_v27 = vrot.slane %v1256_v19, 4  ;;  %v1261_v28 = vrot.slane %v1259_v20, 5  ;;  %v688_v45 = vrot.slane %v687_v7, 4  ;;  %v3096_v53 = vld [vmem:[#allocation2 + $0x2c] sm:$0x1] }
 0x108   : > { %v679_v29 = vsel %vm3066_vm12, %v674_v60, %v678_v14  ;;  %v1270_v33 = vshrl.u32 %v1241_v18, 16  ;;  %v1273_v48 = vshll.u32 %v1241_v18, 16  ;;  %v706_v38 = vrot.slane %v704_v8, 5  ;;  %v3111_v13 = vld [vmem:[%s3418_s3 + $0x4] sm:$0x3] }
 0x109   : > { %v2397_v34 = vcombine.low %v665_v21, %v679_v29  ;;  %v701_v35 = vor.u32 %v700_v26, %v697_v5  ;;  %v1262_v12 = vor.u32 %v1261_v28, %v1258_v27  ;;  %v693_v50 = vsel %vm3066_vm12, %v688_v45, %v692_v23  ;;  %v3115_v17 = vld [vmem:[#allocation2 + $0x38] sm:$0xf]  ;;  %v3130_v29 = vld [vmem:[#allocation2 + $0x3c] sm:$0x1] }
 0x10a   : > { %v1272_v39 = vrot.slane %v1270_v33, 4  ;;  %v1279_v52 = vshll.u32 %v3083_v31, 16  ;;  %v2791_v54 = vld [vmem:[#allocation2 + $0x38] ss:$8 sps:$4 sm:$0xff]   ;;  %v1267_v55 = vrot.slane %v1265_v32, 5  ;;  %v1275_v56 = vrot.slane %v1273_v48, 5 }
 0x10b   : > { %2601 = vmatprep.mubr.msk.bf16.mxu0 %vm778_vm11, %v2397_v34  ;;  %v2790_v49 = vld [vmem:[#allocation2 + $0x28] ss:$8 sps:$4 sm:$0xff]   ;;  %v702_v51 = vrot.slane %v701_v35, 4  ;;  %v1263_v61 = vrot.slane %v1262_v12, 4  ;;  %v709_v62 = vshrl.u32 %v3086_v36, 16  ;;  %v712_v63 = vshll.u32 %v3086_v36, 16 }
 0x10c   : > { %2635 = vmatprep.mubr.msk.bf16.mxu1 %vm778_vm11, %v2790_v49  ;;  %v3103_v0 = vld [vmem:[#allocation2 + $0x30] sm:$0xf]  ;;  %v1276_v4 = vor.u32 %v1275_v56, %v1272_v39  ;;  %v718_v9 = vshll.u32 %v3090_v42, 16  ;;  %v723_v10 = vshrl.u32 %v3088_v40, 16  ;;  %v1281_v14 = vrot.slane %v1279_v52, 5 }
 0x10d   : > { %v707_v57 = vsel %vm3066_vm12, %v702_v51, %v706_v38  ;;  %2636 = vmatmul.mubr.msk.bf16.vlgmr.msra.gmra.mrb[0].mxu1 %vm778_vm11, %v2791_v54  ;;  %v711_v15 = vrot.slane %v709_v62, 4  ;;  %v714_v24 = vrot.slane %v712_v63, 5  ;;  %v726_v5 = vshll.u32 %v3088_v40, 16  ;;  %v3124_v8 = vld [vmem:[#allocation2 + $0x34] sm:$0x1] }
 0x10e   : > { %v2398_v2 = vcombine.low %v693_v50, %v707_v57  ;;  %2640 = vmatpush3.bf16.msra.mxu1 %v3022_v22  ;;  %v1277_v18 = vrot.slane %v1276_v4, 4  ;;  %v725_v19 = vrot.slane %v723_v10, 4  ;;  %v732_v20 = vshll.u32 %v3096_v53, 16  ;;  %v1243_v26 = vld [vmem:[#allocation2 + $0x18] sm:$0xf] }
 0x10f   : > { %2771 = vmatprep.subr.msk.bf16.mxu1 %vm791_vm8, %v3009_v6  ;;  %v737_v21 = vshrl.u32 %v3103_v0, 16  ;;  %v1268_v22 = vsel %vm3066_vm12, %v1263_v61, %v1267_v55  ;;  %v715_v60 = vor.u32 %v714_v24, %v711_v15  ;;  %v728_v7 = vrot.slane %v726_v5, 5  ;;  %v3135_v12 = vld [vmem:[#allocation2] sm:$0xe]  ;;  %v3143_v57 = vld [vmem:[#allocation2 + $0x1c] sm:$0x1] }
 0x110   : > { %2602 = vmatmul.mubr.msk.bf16.vlgmr.msra.gmra.mrb[8].mxu0 %vm778_vm11, %v2398_v2  ;;  %v740_v23 = vshll.u32 %v3103_v0, 16  ;;  %v1282_v27 = vsel %vm3066_vm12, %v1277_v18, %v1281_v14  ;;  %v720_v28 = vrot.slane %v718_v9, 5  ;;  %v751_v45 = vshrl.u32 %v3115_v17, 16  ;;  %v1245_v49 = vld [vmem:[#allocation2 + $0x20] sm:$0xf] }
 0x111   : > { %2610 = vmatpush3.bf16.msra.mxu0 %v3054_v1  ;;  %v739_v6 = vrot.slane %v737_v21, 4  ;;  %v2440_v32 = vcombine.low %v1268_v22, %v1282_v27  ;;  %v716_v33 = vrot.slane %v715_v60, 4  ;;  %v729_v34 = vor.u32 %v728_v7, %v725_v19  ;;  %v3148_v4 = vld [vmem:[#allocation2 + $0x24] sm:$0x1]  ;;  %v1247_v18 = vld [vmem:[#allocation2 + $0x28] sm:$0xf] }
 0x112   : > { %2767 = vmatprep.subr.msk.bf16.mxu0 %vm791_vm8, %v3111_v13  ;;  %v742_v35 = vrot.slane %v740_v23, 5  ;;  %v734_v48 = vrot.slane %v732_v20, 5  ;;  %v746_v1 = vshll.u32 %v3124_v8, 16  ;;  %v753_v38 = vrot.slane %v751_v45, 4  ;;  %v1249_v60 = vld [vmem:[#allocation2 + $0x30] sm:$0xf] }
 0x113   : > { %v754_v39 = vshll.u32 %v3115_v17, 16  ;;  %2641 = vmatprep.mubr.msk.bf16.mxu1 %vm778_vm11, %v2440_v32  ;;  %v730_v50 = vrot.slane %v729_v34, 4  ;;  %v760_v52 = vshll.u32 %v3130_v29, 16  ;;  %v1284_v54 = vshrl.u32 %v1243_v26, 16 }
 0x114   : > { %v743_v51 = vor.u32 %v742_v35, %v739_v6  ;;  %v721_v55 = vsel %vm3066_vm12, %v716_v33, %v720_v28  ;;  %v1287_v61 = vshll.u32 %v1243_v26, 16  ;;  %v2413_v62 = vrot.slane %v3135_v12, 9  ;;  %v3155_v6 = vld [vmem:[#allocation2 + $0x2c] sm:$0x1] }
 0x115   : > { %v756_v56 = vrot.slane %v754_v39, 5  ;;  %v735_v63 = vsel %vm3066_vm12, %v730_v50, %v734_v48  ;;  %v1286_v9 = vrot.slane %v1284_v54, 4  ;;  %v1298_v10 = vshrl.u32 %v1245_v49, 16  ;;  %v1251_v39 = vld [vmem:[#allocation2 + $0x38] sm:$0xf] }
 0x116   : > { %v744_v2 = vrot.slane %v743_v51, 4  ;;  %v2399_v14 = vcombine.low %v721_v55, %v735_v63  ;;  %v748_v15 = vrot.slane %v746_v1, 5  ;;  %v1289_v5 = vrot.slane %v1287_v61, 5  ;;  %v3162_v1 = vld [vmem:[#allocation2 + $0x34] sm:$0x1] }
 0x117   : > { %v757_v24 = vor.u32 %v756_v56, %v753_v38  ;;  %v762_v19 = vrot.slane %v760_v52, 5  ;;  %v1293_v20 = vshll.u32 %v3143_v57, 16  ;;  %v1300_v21 = vrot.slane %v1298_v10, 4  ;;  %v1253_v54 = vld [vmem:[#allocation2 + $0x40] sm:$0xf] }
 0x118   : > { %v1301_v22 = vshll.u32 %v1245_v49, 16  ;;  %2605 = vmatprep.mubr.msk.bf16.mxu0 %vm778_vm11, %v2399_v14  ;;  %v749_v7 = vsel %vm3066_vm12, %v744_v2, %v748_v15  ;;  %v1290_v26 = vor.u32 %v1289_v5, %v1286_v9  ;;  %v1307_v27 = vshll.u32 %v3148_v4, 16 }
 0x119   : > { %v758_v23 = vrot.slane %v757_v24, 4  ;;  %v1312_v45 = vshrl.u32 %v1247_v18, 16  ;;  %v1315_v32 = vshll.u32 %v1247_v18, 16  ;;  %v989_v33 = vrot.slane %v2981_v3, 5 }
 0x11a   : > { %v1303_v28 = vrot.slane %v1301_v22, 5  ;;  %v1291_v35 = vrot.slane %v1290_v26, 4  ;;  %v2405_v48 = vcombine.low %v2964_v47, %v3030_v30  ;;  %v1326_v38 = vshrl.u32 %v1249_v60, 16  ;;  %v3179_v22 = vld [vmem:[%s3418_s3 + $0xc] sm:$0x3] }
 0x11b   : > { %v763_v34 = vsel %vm3066_vm12, %v758_v23, %v762_v19  ;;  %v1314_v51 = vrot.slane %v1312_v45, 4  ;;  %v1317_v52 = vrot.slane %v1315_v32, 5  ;;  %v1295_v55 = vrot.slane %v1293_v20, 5  ;;  %v3172_v19 = vld [vmem:[#allocation2 + $0x3c] sm:$0x1] }
 0x11c   : > { %v2400_v49 = vcombine.low %v749_v7, %v763_v34  ;;  %v1304_v50 = vor.u32 %v1303_v28, %v1300_v21  ;;  %v1309_v56 = vrot.slane %v1307_v27, 5  ;;  %v1328_v61 = vrot.slane %v1326_v38, 4  ;;  %v3174_v20 = vld [vmem:[#allocation2 + $0x44] sm:$0x1]  ;;  %v1469_v28 = vld [vmem:[#allocation2 + $0x8] sm:$0xe] }
 0x11d   : > { %v1329_v63 = vshll.u32 %v1249_v60, 16  ;;  %v1318_v9 = vor.u32 %v1317_v52, %v1314_v51  ;;  %v1321_v47 = vshll.u32 %v3155_v6, 16  ;;  %v1340_v30 = vshrl.u32 %v1251_v39, 16 }
 0x11e   : > { %2606 = vmatmul.mubr.msk.bf16.gmra.mrb[12].mxu0 %vm778_vm11, %v2400_v49  ;;  %v1305_v2 = vrot.slane %v1304_v50, 4  ;;  %v1335_v14 = vshll.u32 %v3162_v1, 16  ;;  %v1343_v15 = vshll.u32 %v1251_v39, 16  ;;  %v1354_v24 = vshrl.u32 %v1253_v54, 16 }
 0x11f   : > { %2611 = vmatprep.mubr.msk.bf16.mxu0 %vm778_vm11, %v2405_v48  ;;  %v1331_v10 = vrot.slane %v1329_v63, 5  ;;  %v1296_v5 = vsel %vm3066_vm12, %v1291_v35, %v1295_v55  ;;  %v1342_v21 = vrot.slane %v1340_v30, 4  ;;  %v1046_v60 = vsel %vm791_vm8, %v3111_v13, 0  ;;  %v1470_v35 = vld [vmem:[#allocation2 + $0x10] sm:$0xe] }
 0x120   : > { %v1310_v18 = vsel %vm3066_vm12, %v1305_v2, %v1309_v56  ;;  %v1319_v23 = vrot.slane %v1318_v9, 4  ;;  %v1345_v27 = vrot.slane %v1343_v15, 5  ;;  %v2406_v45 = vcombine.low %v3044_v44, %v3028_v25  ;;  %v961_v48 = vld [vmem:[#allocation2 + $0x8] sm:$0xe]  ;;  %v1472_v15 = vld [vmem:[#allocation2 + $0x20] sm:$0xe] }
 0x121   : > { %v2441_v7 = vcombine.low %v1296_v5, %v1310_v18  ;;  %v1332_v26 = vor.u32 %v1331_v10, %v1328_v61  ;;  %v1356_v32 = vrot.slane %v1354_v24, 4  ;;  %v1357_v34 = vshll.u32 %v1253_v54, 16  ;;  %v1474_v5 = vld [vmem:[#allocation2 + $0x30] sm:$0xe] }
 0x122   : > { %v1323_v38 = vrot.slane %v1321_v47, 5  ;;  %v1337_v49 = vrot.slane %v1335_v14, 5  ;;  %v1346_v50 = vor.u32 %v1345_v27, %v1342_v21  ;;  %v1349_v13 = vshll.u32 %v3172_v19, 16  ;;  %v1473_v27 = vld [vmem:[#allocation2 + $0x28] sm:$0xe] }
 0x123   : > { %2642 = vmatmul.mubr.msk.bf16.vlgmr.msra.gmra.mrb[4].mxu1 %vm778_vm11, %v2441_v7  ;;  %v1333_v39 = vrot.slane %v1332_v26, 4  ;;  %v1359_v51 = vrot.slane %v1357_v34, 5  ;;  %v1363_v52 = vshll.u32 %v3174_v20, 16  ;;  %v2407_v25 = vcombine.low %v3086_v36, %v3088_v40  ;;  %v962_v7 = vld [vmem:[#allocation2 + $0x10] sm:$0xe] }
 0x124   : > { %2650 = vmatpush3.bf16.msra.mxu1 %v3026_v59  ;;  %v1324_v44 = vsel %vm3066_vm12, %v1319_v23, %v1323_v38  ;;  %v2449_v55 = vrot.slane %v1470_v35, 9  ;;  %v1499_v56 = vrot.slane %v3083_v31, 5  ;;  %v1347_v61 = vrot.slane %v1346_v50, 4 }
 0x125   : > { %v1338_v54 = vsel %vm3066_vm12, %v1333_v39, %v1337_v49  ;;  %2772 = vmatprep.subr.msk.bf16.mxu1 %vm791_vm8, %v3179_v22  ;;  %v1360_v63 = vor.u32 %v1359_v51, %v1356_v32  ;;  %v2448_v2 = vrot.slane %v1469_v28, 9  ;;  %v1495_v40 = vrot.slane %v3073_v16, 5  ;;  %v965_v28 = vld [vmem:[#allocation2 + $0x28] sm:$0xe]  ;;  %v963_v32 = vld [vmem:[#allocation2 + $0x18] sm:$0xe] }
 0x126   : > { %v2442_v59 = vcombine.low %v1324_v44, %v1338_v54  ;;  %2612 = vmatmul.mubr.msk.bf16.vlgmr.msra.gmra.mrb[8].mxu0 %vm778_vm11, %v2406_v45  ;;  %v2414_v31 = vrot.slane %v961_v48, 9  ;;  %v1351_v9 = vrot.slane %v1349_v13, 5  ;;  %v1365_v30 = vrot.slane %v1363_v52, 5  ;;  %v1476_v51 = vld [vmem:[#allocation2 + $0x40] sm:$0xe] }
 0x127   : > { %2615 = vmatprep.mubr.msk.bf16.mxu0 %vm778_vm11, %v2407_v25  ;;  %2620 = vmatpush3.bf16.msra.mxu0 %v1046_v60  ;;  %v1361_v47 = vrot.slane %v1360_v63, 4  ;;  %v993_v10 = vrot.slane %v3040_v37, 5  ;;  %v1500_v14 = vsel %vm3202_vm15, %v2449_v55, %v1499_v56  ;;  %v990_v37 = vsel %vm3202_vm15, %v2413_v62, %v989_v33  ;;  %v1471_v60 = vld [vmem:[#allocation2 + $0x18] sm:$0xe]  ;;  %v966_v56 = vld [vmem:[#allocation2 + $0x30] sm:$0xe] }
 0x128   : > { %2645 = vmatprep.mubr.msk.bf16.mxu1 %vm778_vm11, %v2442_v59  ;;  %2768 = vmatprep.subr.msk.bf16.mxu0 %vm791_vm8, %v2936_v41  ;;  %v1352_v24 = vsel %vm3066_vm12, %v1347_v61, %v1351_v9  ;;  %v1496_v21 = vsel %vm3202_vm15, %v2448_v2, %v1495_v40  ;;  %v1507_v23 = vrot.slane %v3148_v4, 5  ;;  %v2408_v3 = vcombine.low %v3103_v0, %v3115_v17  ;;  %v964_v17 = vld [vmem:[#allocation2 + $0x20] sm:$0xe]  ;;  %v1475_v44 = vld [vmem:[#allocation2 + $0x38] sm:$0xe] }
 0x129   : > { %v1366_v16 = vsel %vm3066_vm12, %v1361_v47, %v1365_v30  ;;  %v994_v41 = vsel %vm3202_vm15, %v2414_v31, %v993_v10  ;;  %v2457_v26 = vcombine.low %v1496_v21, %v1500_v14  ;;  %v2451_v12 = vrot.slane %v1472_v15, 9  ;;  %v2474_v2 = vld [vmem:[%s3418_s3 + $0xe] sm:$0x3]  ;;  %v967_v9 = vld [vmem:[#allocation2 + $0x38] sm:$0xe] }
 0x12a   : > { %v2443_v18 = vcombine.low %v1352_v24, %v1366_v16  ;;  %v2422_v62 = vcombine.low %v990_v37, %v994_v41  ;;  %v2453_v33 = vrot.slane %v1474_v5, 9  ;;  %v1515_v45 = vrot.slane %v3162_v1, 5  ;;  %v1746_v14 = vld [vmem:[#allocation2 + $0x10] sm:$0xf] }
 0x12b   : > { %v1503_v34 = vrot.slane %v3143_v57, 5  ;;  %v2450_v4 = vrot.slane %v1471_v60, 9  ;;  %v2415_v35 = vrot.slane %v962_v7, 9  ;;  %v997_v0 = vrot.slane %v3050_v58, 5  ;;  %v2796_v7 = vld [vmem:[#allocation2 + $0x10] ss:$8 sps:$4 sm:$0xff]  }
 0x12c   : > { %2646 = vmatmul.mubr.msk.bf16.gmra.mrb[0].mxu1 %vm778_vm11, %v2443_v18  ;;  %v2452_v48 = vrot.slane %v1473_v27, 9  ;;  %v1511_v38 = vrot.slane %v3155_v6, 5  ;;  %v2418_v39 = vrot.slane %v965_v28, 9  ;;  %v1508_v1 = vsel %vm3202_vm15, %v2451_v12, %v1507_v23  ;;  %v2798_v12 = vld [vmem:[#allocation2 + $0x8] ss:$8 sps:$4 sm:$0xff]  }
 0x12d   : > { %2651 = vmatprep.mubr.msk.bf16.mxu1 %vm778_vm11, %v2457_v26  ;;  %v2416_v49 = vrot.slane %v963_v32, 9  ;;  %v1001_v57 = vrot.slane %v3070_v46, 5  ;;  %v1009_v50 = vrot.slane %v3096_v53, 5  ;;  %v1516_v13 = vsel %vm3202_vm15, %v2453_v33, %v1515_v45  ;;  %v1754_v27 = vld [vmem:[#allocation2 + $0x30] sm:$0xf] }
 0x12e   : > { %2616 = vmatmul.mubr.msk.bf16.gmra.mrb[12].mxu0 %vm778_vm11, %v2408_v3  ;;  %v2417_v58 = vrot.slane %v964_v17, 9  ;;  %v1005_v52 = vrot.slane %v3090_v42, 5  ;;  %v1504_v25 = vsel %vm3202_vm15, %v2450_v4, %v1503_v34  ;;  %v998_v6 = vsel %vm3202_vm15, %v2415_v35, %v997_v0  ;;  %v1752_v3 = vld [vmem:[#allocation2 + $0x28] sm:$0xf]  ;;  %v1750_v33 = vld [vmem:[#allocation2 + $0x20] sm:$0xf] }
 0x12f   : > { %2621 = vmatprep.mubr.msk.bf16.mxu0 %vm778_vm11, %v2422_v62  ;;  %v2458_v54 = vcombine.low %v1504_v25, %v1508_v1  ;;  %v1671_v46 = vsel %vm791_vm8, %v3179_v22, 0  ;;  %v1512_v53 = vsel %vm3202_vm15, %v2452_v48, %v1511_v38  ;;  %v1010_v55 = vsel %vm3202_vm15, %v2418_v39, %v1009_v50  ;;  %v3284_v45 = vld [vmem:[#allocation2 + $0x14] sm:$0x1]  ;;  %v1756_v4 = vld [vmem:[#allocation2 + $0x38] sm:$0xf] }
 0x130   : > { %v2459_v59 = vcombine.low %v1512_v53, %v1516_v13  ;;  %v1002_v42 = vsel %vm3202_vm15, %v2416_v49, %v1001_v57  ;;  %v2455_v61 = vrot.slane %v1476_v51, 9  ;;  %v1523_v63 = vrot.slane %v3174_v20, 5  ;;  %v1760_v38 = vld [vmem:[#allocation2 + $0x48] sm:$0xf]  ;;  %v3287_v39 = vld [vmem:[#allocation2 + $0x1c] sm:$0x1] }
 0x131   : > { %v2423_v22 = vcombine.low %v998_v6, %v1002_v42  ;;  %v2454_v40 = vrot.slane %v1475_v44, 9  ;;  %v1006_v31 = vsel %vm3202_vm15, %v2417_v58, %v1005_v52  ;;  %v1519_v47 = vrot.slane %v3172_v19, 5  ;;  %v1748_v19 = vld [vmem:[#allocation2 + $0x18] sm:$0xf]  ;;  %v3292_v1 = vld [vmem:[%s3418_s3 + $0x10] sm:$0x3] }
 0x132   : > { %v2424_v30 = vcombine.low %v1006_v31, %v1010_v55  ;;  %v2419_v10 = vrot.slane %v966_v56, 9  ;;  %v1013_v20 = vrot.slane %v3124_v8, 5  ;;  %v1524_v15 = vsel %vm3202_vm15, %v2455_v61, %v1523_v63  ;;  %v2797_v50 = vld [vmem:[#allocation2 + $0x20] ss:$8 sps:$4 sm:$0xff]   ;;  %v2799_v25 = vld [vmem:[#allocation2 + $0x30] ss:$8 sps:$4 sm:$0xff]  }
 0x133   : > { %v2420_v24 = vrot.slane %v967_v9, 9  ;;  %v1017_v16 = vrot.slane %v3130_v29, 5  ;;  %v1763_v37 = vshrl.u32 %v1746_v14, 16  ;;  %v1766_v41 = vshll.u32 %v1746_v14, 16  ;;  %v2800_v6 = vld [vmem:[#allocation2 + $0x18] ss:$8 sps:$4 sm:$0xff]  }
 0x134   : > { %2652 = vmatmul.mubr.msk.bf16.vlgmr.msra.gmra.mrb[4].mxu1 %vm778_vm11, %v2458_v54  ;;  %v1520_v8 = vsel %vm3202_vm15, %v2454_v40, %v1519_v47  ;;  %v1014_v5 = vsel %vm3202_vm15, %v2419_v10, %v1013_v20  ;;  %v1777_v21 = vshrl.u32 %v1748_v19, 16  ;;  %v1780_v60 = vshll.u32 %v1748_v19, 16  ;;  %v3301_v31 = vld [vmem:[#allocation2 + $0x2c] sm:$0x1]  ;;  %v3305_v20 = vld [vmem:[#allocation2 + $0x34] sm:$0x1] }
 0x135   : > { %2660 = vmatpush3.bf16.msra.mxu1 %v1671_v46  ;;  %2655 = vmatprep.mubr.msk.bf16.mxu1 %vm778_vm11, %v2459_v59  ;;  %v2460_v18 = vcombine.low %v1520_v8, %v1524_v15  ;;  %v1018_v23 = vsel %vm3202_vm15, %v2420_v24, %v1017_v16  ;;  %v1768_v26 = vrot.slane %v1766_v41, 5  ;;  %v1805_v32 = vshrl.u32 %v1752_v3, 16  ;;  %v1758_v59 = vld [vmem:[#allocation2 + $0x40] sm:$0xf]  ;;  %v3310_v8 = vld [vmem:[#allocation2 + $0x3c] sm:$0x1] }
 0x136   : > { %2622 = vmatmul.mubr.msk.bf16.vlgmr.msra.gmra.mrb[8].mxu0 %vm778_vm11, %v2423_v22  ;;  %2773 = vmatprep.subr.msk.bf16.mxu1 %vm791_vm8, %v2474_v2  ;;  %v2425_v29 = vcombine.low %v1014_v5, %v1018_v23  ;;  %v1779_v28 = vrot.slane %v1777_v21, 4  ;;  %v1782_v62 = vrot.slane %v1780_v60, 5  ;;  %v1808_v34 = vshll.u32 %v1752_v3, 16  ;;  %v2801_v21 = vld [vmem:[#allocation2 + $0x40] ss:$8 sps:$4 sm:$0xff]  }
 0x137   : > { %2625 = vmatprep.mubr.msk.bf16.mxu0 %vm778_vm11, %v2424_v30  ;;  %2630 = vmatpush3.bf16.msra.mxu0 %v2946_v43  ;;  %v1765_v43 = vrot.slane %v1763_v37, 4  ;;  %v1901_v35 = vsel %vm791_vm8, %v2474_v2, 0  ;;  %v1819_v17 = vshrl.u32 %v1754_v27, 16  ;;  %v1822_v48 = vshll.u32 %v1754_v27, 16  ;;  %v3303_v30 = vld [vmem:[#allocation2 + $0x24] sm:$0x1] }
 0x138   : > { %v1791_v49 = vshrl.u32 %v1750_v33, 16  ;;  %v1794_v57 = vshll.u32 %v1750_v33, 16  ;;  %v1772_v13 = vshll.u32 %v3284_v45, 16  ;;  %v1783_v51 = vor.u32 %v1782_v62, %v1779_v28 }
 0x139   : > { %v1769_v0 = vor.u32 %v1768_v26, %v1765_v43  ;;  %v1833_v58 = vshrl.u32 %v1756_v4, 16  ;;  %v1836_v52 = vshll.u32 %v1756_v4, 16  ;;  %v1807_v44 = vrot.slane %v1805_v32, 4  ;;  %v3319_v4 = vld [vmem:[#allocation2 + $0x44] sm:$0x1] }
 0x13a   : > { %v1810_v54 = vrot.slane %v1808_v34, 5  ;;  %v1786_v53 = vshll.u32 %v3287_v39, 16  ;;  %v1821_v55 = vrot.slane %v1819_v17, 4  ;;  %v1824_v56 = vrot.slane %v1822_v48, 5 }
 0x13b   : > { %v1770_v46 = vrot.slane %v1769_v0, 4  ;;  %v1793_v42 = vrot.slane %v1791_v49, 4  ;;  %v1796_v61 = vrot.slane %v1794_v57, 5  ;;  %v1861_v63 = vshrl.u32 %v1760_v38, 16 }
 0x13c   : > { %2656 = vmatmul.mubr.msk.bf16.gmra.mrb[0].mxu1 %vm778_vm11, %v2460_v18  ;;  %v1864_v2 = vshll.u32 %v1760_v38, 16  ;;  %v1774_v22 = vrot.slane %v1772_v13, 5  ;;  %v1784_v40 = vrot.slane %v1783_v51, 4  ;;  %v1835_v9 = vrot.slane %v1833_v58, 4  ;;  %v1976_v58 = vld [vmem:[#allocation2 + $0x10] sm:$0xe] }
 0x13d   : > { %2661 = vmatprep.mubr.msk.bf16.mxu1 %vm778_vm11, %v2796_v7  ;;  %v1838_v47 = vrot.slane %v1836_v52, 5  ;;  %v1811_v10 = vor.u32 %v1810_v54, %v1807_v44  ;;  %v1847_v14 = vshrl.u32 %v1758_v59, 16  ;;  %v1850_v15 = vshll.u32 %v1758_v59, 16 }
 0x13e   : > { %2626 = vmatmul.mubr.msk.bf16.gmra.mrb[12].mxu0 %vm778_vm11, %v2425_v29  ;;  %v1775_v24 = vsel %vm3066_vm12, %v1770_v46, %v1774_v22  ;;  %v1788_v16 = vrot.slane %v1786_v53, 5  ;;  %v1825_v19 = vor.u32 %v1824_v56, %v1821_v55  ;;  %v1797_v37 = vor.u32 %v1796_v61, %v1793_v42  ;;  %v1977_v55 = vld [vmem:[#allocation2 + $0x18] sm:$0xe] }
 0x13f   : > { %2631 = vmatprep.mubr.msk.bf16.mxu0 %vm778_vm11, %v2798_v12  ;;  %v1814_v41 = vshll.u32 %v3301_v31, 16  ;;  %v1863_v5 = vrot.slane %v1861_v63, 4  ;;  %v1866_v18 = vrot.slane %v1864_v2, 5  ;;  %v1800_v7 = vshll.u32 %v3303_v30, 16 }
 0x140   : > { %v1789_v60 = vsel %vm3066_vm12, %v1784_v40, %v1788_v16  ;;  %v1828_v23 = vshll.u32 %v3305_v20, 16  ;;  %v1839_v29 = vor.u32 %v1838_v47, %v1835_v9  ;;  %v1812_v26 = vrot.slane %v1811_v10, 4  ;;  %v1979_v40 = vld [vmem:[#allocation2 + $0x28] sm:$0xe]  ;;  %v1980_v9 = vld [vmem:[#allocation2 + $0x30] sm:$0xe] }
 0x141   : > { %v2475_v43 = vcombine.low %v1775_v24, %v1789_v60  ;;  %v1849_v3 = vrot.slane %v1847_v14, 4  ;;  %v1852_v12 = vrot.slane %v1850_v15, 5  ;;  %v1826_v27 = vrot.slane %v1825_v19, 4  ;;  %v1978_v10 = vld [vmem:[#allocation2 + $0x20] sm:$0xe] }
 0x142   : > { %v1842_v28 = vshll.u32 %v3310_v8, 16  ;;  %v1798_v62 = vrot.slane %v1797_v37, 4  ;;  %v1816_v33 = vrot.slane %v1814_v41, 5  ;;  %v1830_v32 = vrot.slane %v1828_v23, 5  ;;  %v1981_v24 = vld [vmem:[#allocation2 + $0x38] sm:$0xe] }
 0x143   : > { %v1840_v34 = vrot.slane %v1839_v29, 4  ;;  %v1867_v0 = vor.u32 %v1866_v18, %v1863_v5  ;;  %v1802_v17 = vrot.slane %v1800_v7, 5  ;;  %v1853_v38 = vor.u32 %v1852_v12, %v1849_v3  ;;  %v1982_v60 = vld [vmem:[#allocation2 + $0x40] sm:$0xe] }
 0x144   : > { %2662 = vmatmul.mubr.msk.bf16.vlgmr.msra.gmra.mrb[4].mxu1 %vm778_vm11, %v2797_v50  ;;  %v1817_v48 = vsel %vm3066_vm12, %v1812_v26, %v1816_v33  ;;  %v1831_v57 = vsel %vm3066_vm12, %v1826_v27, %v1830_v32  ;;  %v1844_v50 = vrot.slane %v1842_v28, 5  ;;  %v1856_v51 = vshll.u32 %v3319_v4, 16  ;;  %v2161_v28 = vld [vmem:[%s3420_s5] sm:$0x3] }
 0x145   : > { %2670 = vmatpush3.bf16.msra.mxu1 %v1901_v35  ;;  %2665 = vmatprep.mubr.msk.bf16.mxu1 %vm778_vm11, %v2799_v25  ;;  %v3321_v35 = vld [vmem:[#allocation2 + $0x4c] sm:$0x1]  ;;  %v1803_v13 = vsel %vm3066_vm12, %v1798_v62, %v1802_v17  ;;  %v2059_v25 = vsel %vm791_vm8, %v3292_v1, 0  ;;  %v1854_v54 = vrot.slane %v1853_v38, 4  ;;  %v1868_v46 = vrot.slane %v1867_v0, 4 }
 0x146   : > { %2632 = vmatmul.mubr.msk.bf16.vlgmr.msra.gmra.mrb[8].mxu0 %vm778_vm11, %v2800_v6  ;;  %2774 = vmatprep.subr.msk.bf16.mxu1 %vm791_vm8, %v3292_v1  ;;  %v1870_v49 = vshll.u32 %v3321_v35, 16  ;;  %v2476_v52 = vcombine.low %v1803_v13, %v1817_v48  ;;  %v1845_v6 = vsel %vm3066_vm12, %v1840_v34, %v1844_v50  ;;  %v2483_v56 = vrot.slane %v1976_v58, 9  ;;  %v2500_v38 = vld [vmem:[%s3419_s4] ss:$0 sm:$0xff] }
 0x147   : > { %v2477_v44 = vcombine.low %v1831_v57, %v1845_v6  ;;  %v2002_v59 = vrot.slane %v3284_v45, 5  ;;  %v1858_v42 = vrot.slane %v1856_v51, 5  ;;  %v2484_v61 = vrot.slane %v1977_v55, 9  ;;  %2775 = vmatprep.subr.msk.bf16.mxu0 %vm791_vm8, %v2161_v28 }
 0x148   : > { %v1872_v53 = vrot.slane %v1870_v49, 5  ;;  %v2006_v1 = vrot.slane %v3287_v39, 5  ;;  %v2486_v15 = vrot.slane %v1979_v40, 9  ;;  %v2014_v39 = vrot.slane %v3301_v31, 5 }
 0x149   : > { %v1859_v63 = vsel %vm3066_vm12, %v1854_v54, %v1858_v42  ;;  %v2003_v22 = vsel %vm3202_vm15, %v2483_v56, %v2002_v59  ;;  %v2487_v16 = vrot.slane %v1980_v9, 9  ;;  %v2018_v11 = vrot.slane %v3305_v20, 5 }
 0x14a   : > { %v1873_v2 = vsel %vm3066_vm12, %v1868_v46, %v1872_v53  ;;  %v2007_v45 = vsel %vm3202_vm15, %v2484_v61, %v2006_v1  ;;  %v2485_v19 = vrot.slane %v1978_v10, 9  ;;  %v2010_v37 = vrot.slane %v3303_v30, 5 }
 0x14b   : > { %v2478_v47 = vcombine.low %v1859_v63, %v1873_v2  ;;  %v2492_v14 = vcombine.low %v2003_v22, %v2007_v45  ;;  %v2488_v41 = vrot.slane %v1981_v24, 9  ;;  %v2022_v5 = vrot.slane %v3310_v8, 5 }
 0x14c   : > { %2666 = vmatmul.mubr.msk.bf16.gmra.mrb[0].mxu1 %vm778_vm11, %v2801_v21  ;;  %v2015_v18 = vsel %vm3202_vm15, %v2486_v15, %v2014_v39  ;;  %v1983_v21 = vld [vmem:[#allocation2 + $0x48] sm:$0xe]  ;;  %v2019_v31 = vsel %vm3202_vm15, %v2487_v16, %v2018_v11  ;;  %v2011_v7 = vsel %vm3202_vm15, %v2485_v19, %v2010_v37  ;;  %v2026_v8 = vrot.slane %v3319_v4, 5 }
 0x14d   : > { %2671 = vmatprep.mubr.msk.bf16.mxu1 %vm778_vm11, %v2475_v43  ;;  %v2493_v20 = vcombine.low %v2011_v7, %v2015_v18  ;;  %v2023_v23 = vsel %vm3202_vm15, %v2488_v41, %v2022_v5  ;;  %v2490_v29 = vrot.slane %v1983_v21, 9  ;;  %v2489_v43 = vrot.slane %v1982_v60, 9  ;;  %v2501_v41 = vld [vmem:[%s3421_s6] ss:$0 sm:$0xff]  ;;  %v2806_v5 = vld [vmem:[%s2878_s8 + $0x8] sm:$0xff]  }
 0x14e   : > { %v2494_v30 = vcombine.low %v2019_v31, %v2023_v23  ;;  %v2030_v26 = vrot.slane %v3321_v35, 5  ;;  %v2182_v62 = vsel %vm791_vm8, %v2161_v28, 0  ;;  %v2251_v18 = vunpack.c.l.bf16 %v2806_v5  ;;  %v2807_v21 = vld [vmem:[%s2878_s8] sm:$0xff]  }
 0x14f   : > { %v2027_v3 = vsel %vm3202_vm15, %v2489_v43, %v2026_v8  ;;  %2690 = vmatpush3.bf16.msra.mxu0 %v2182_v62  ;;  %v2249_v31 = vunpack.c.l.bf16 %v2807_v21  ;;  %v2252_v23 = vunpack.c.h.bf16 %v2806_v5 }
 0x150   : > { %v2031_v12 = vsel %vm3202_vm15, %v2490_v29, %v2030_v26  ;;  %v2250_v29 = vunpack.c.h.bf16 %v2807_v21 }
 0x151   : > { %v2495_v27 = vcombine.low %v2027_v3, %v2031_v12 }
 0x154   : > { %2672 = vmatmul.mubr.msk.bf16.vlgmr.msra.gmra.mrb[4].mxu1 %vm778_vm11, %v2476_v52 }
 0x155   : > { %2680 = vmatpush3.bf16.msra.mxu1 %v2059_v25  ;;  %2675 = vmatprep.mubr.msk.bf16.mxu1 %vm778_vm11, %v2477_v44 }
 0x15c   : > { %2676 = vmatmul.mubr.msk.bf16.gmra.mrb[0].mxu1 %vm778_vm11, %v2478_v47 }
 0x15d   : > { %2681 = vmatprep.mubr.msk.bf16.mxu1 %vm778_vm11, %v2492_v14 }
 0x164   : > { %2682 = vmatmul.mubr.msk.bf16.vlgmr.msra.gmra.mrb[4].mxu1 %vm778_vm11, %v2493_v20 }
 0x165   : > { %2685 = vmatprep.mubr.msk.bf16.mxu1 %vm778_vm11, %v2494_v30 }
 0x16c   : > { %2686 = vmatmul.mubr.msk.bf16.gmra.mrb[0].mxu1 %vm778_vm11, %v2495_v27 }
 0x211   : > { %v2627_v33 = vpop.f32.mrb[12].mxu0 }
 0x212   : > { %v1098_v32 = vpop.f32.mrb[13].mxu0 }
 0x213   : > { %v2628_v34 = vpop.f32.mrb[14].mxu0 }
 0x214   : > { %v1101_v4 = vpop.f32.mrb[15].mxu0 }
 0x219   : > { %v2633_v35 = vpop.f32.mrb[8].mxu0 }
 0x21a   : > { %v1200_v0 = vpop.f32.mrb[9].mxu0 }
 0x21b   : > { %v2634_v36 = vpop.f32.mrb[10].mxu0 }
 0x21c   : > { %v1203_v17 = vpop.f32.mrb[11].mxu0 }
 0x237   : > { %v2683_v48 = vpop.f32.mrb[4].mxu1 }
 0x238   : > { %v2701_v49 = vadd.f32 %v2683_v48, %v2633_v35  ;;  %v2095_v57 = vpop.f32.mrb[5].mxu1  ;;  %v2808_v35 = vld [vmem:[%s2878_s8 + $0x18] sm:$0xff]  }
 0x239   : > { %v2702_v50 = vadd.f32 %v2095_v57, %v1200_v0  ;;  %v2684_v13 = vpop.f32.mrb[6].mxu1  ;;  %v2255_v0 = vunpack.c.l.bf16 %v2808_v35 }
 0x23a   : > { %v2143_v51 = vadd.f32 %v2701_v49, %v2500_v38  ;;  %v2703_v58 = vadd.f32 %v2684_v13, %v2634_v36  ;;  %v2098_v52 = vpop.f32.mrb[7].mxu1 }
 0x23b   : > { %v2141_v25 = vadd.f32 %v2702_v50, %v2500_v38  ;;  %v2704_v6 = vadd.f32 %v2098_v52, %v1203_v17 }
 0x23c   : > { %v2144_v44 = vadd.f32 %v2703_v58, %v2500_v38  ;;  %v2151_v46 = vmax.f32 %v2143_v51, 0.0  ;;  %v2256_v51 = vunpack.c.h.bf16 %v2808_v35 }
 0x23d   : > { %v2142_v54 = vadd.f32 %v2704_v6, %v2500_v38  ;;  %v2149_v55 = vmax.f32 %v2141_v25, 0.0 }
 0x23e   : > { %v2152_v53 = vmax.f32 %v2144_v44, 0.0 }
 0x23f   : > { %v2150_v56 = vmax.f32 %v2142_v54, 0.0  ;;  %v2687_v59 = vpop.f32.mrb[0].mxu1 }
 0x240   : > { %v2158_v42 = vpack.c.bf16 %v2152_v53, %v2151_v46  ;;  %v2705_v61 = vadd.f32 %v2687_v59, %v2627_v33  ;;  %v2111_v1 = vpop.f32.mrb[1].mxu1 }
 0x241   : > { %v2157_v63 = vpack.c.bf16 %v2150_v56, %v2149_v55  ;;  %v2706_v2 = vadd.f32 %v2111_v1, %v1098_v32  ;;  %v2688_v22 = vpop.f32.mrb[2].mxu1 }
 0x242   : > { %v2147_v40 = vadd.f32 %v2705_v61, %v2500_v38  ;;  %v2707_v9 = vadd.f32 %v2688_v22, %v2628_v34  ;;  %v2114_v47 = vpop.f32.mrb[3].mxu1 }
 0x243   : > { %v2145_v45 = vadd.f32 %v2706_v2, %v2500_v38  ;;  %v2708_v10 = vadd.f32 %v2114_v47, %v1101_v4  ;;  %2691 = vmatprep.mubr.msk.bf16.mxu0 %vm778_vm11, %v2157_v63 }
 0x244   : > { %v2148_v14 = vadd.f32 %v2707_v9, %v2500_v38  ;;  %2692 = vmatmul.mubr.msk.bf16.vlgmr.msra.gmra.mrb[16].mxu0 %vm778_vm11, %v2158_v42  ;;  %v2155_v39 = vmax.f32 %v2147_v40, 0.0 }
 0x245   : > { %v2146_v15 = vadd.f32 %v2708_v10, %v2500_v38  ;;  %v2153_v16 = vmax.f32 %v2145_v45, 0.0  ;;  %v2809_v38 = vld [vmem:[%s2878_s8 + $0x10] sm:$0xff]  }
 0x246   : > { %v2156_v24 = vmax.f32 %v2148_v14, 0.0  ;;  %v2253_v49 = vunpack.c.l.bf16 %v2809_v38  ;;  %v2254_v6 = vunpack.c.h.bf16 %v2809_v38 }
 0x247   : > { %v2154_v11 = vmax.f32 %v2146_v15, 0.0 }
 0x248   : > { %v2160_v19 = vpack.c.bf16 %v2156_v24, %v2155_v39 }
 0x249   : > { %v2159_v37 = vpack.c.bf16 %v2154_v11, %v2153_v16 }
 0x24b   : > { %2695 = vmatprep.mubr.msk.bf16.mxu0 %vm778_vm11, %v2159_v37 }
 0x24c   : > { %2696 = vmatmul.mubr.msk.bf16.gmra.mrb[20].mxu0 %vm778_vm11, %v2160_v19 }
 0x317   : > { %v2693_v60 = vpop.f32.mrb[16].mxu0 }
 0x318   : > { %v2227_v7 = vadd.f32 %v2693_v60, %v2501_v41  ;;  %v2218_v20 = vpop.f32.mrb[17].mxu0 }
 0x319   : > { %v2219_v30 = vadd.f32 %v2501_v41, %v2218_v20  ;;  %v2694_v43 = vpop.f32.mrb[18].mxu0 }
 0x31a   : > { %v2259_v8 = vadd.f32 %v2251_v18, %v2227_v7  ;;  %v2230_v26 = vadd.f32 %v2694_v43, %v2501_v41  ;;  %v2221_v3 = vpop.f32.mrb[19].mxu0 }
 0x31b   : > { %v2257_v12 = vadd.f32 %v2249_v31, %v2219_v30  ;;  %v2222_v27 = vadd.f32 %v2501_v41, %v2221_v3 }
 0x31c   : > { %v2267_v28 = vmax.f32 %v2259_v8, 0.0  ;;  %v2260_v62 = vadd.f32 %v2252_v23, %v2230_v26 }
 0x31d   : > { %v2265_v33 = vmax.f32 %v2257_v12, 0.0  ;;  %v2258_v32 = vadd.f32 %v2250_v29, %v2222_v27 }
 0x31e   : > { %v2528_v34 = vpack.c.bf16 %v2267_v28, %v2267_v28  ;;  %v2268_v4 = vmax.f32 %v2260_v62, 0.0 }
 0x31f   : > { %v2526_v36 = vpack.c.bf16 %v2265_v33, %v2265_v33  ;;  %v2266_v17 = vmax.f32 %v2258_v32, 0.0  ;;  %v2697_v48 = vpop.f32.mrb[20].mxu0 }
 0x320   : > { %2308 = vst.msk [vmem:[%s3392_s18 + $0x8] sm:$0xf] %vm2305_vm0, %v2528_v34  ;;  %v2529_v57 = vpack.c.bf16 %v2268_v4, %v2268_v4  ;;  %v2243_v50 = vadd.f32 %v2697_v48, %v2501_v41  ;;  %v2234_v13 = vpop.f32.mrb[21].mxu0 }
 0x321   : > { %2306 = vst.msk [vmem:[%s3392_s18] sm:$0xf] %vm2305_vm0, %v2526_v36  ;;  %v2527_v58 = vpack.c.bf16 %v2266_v17, %v2266_v17  ;;  %v2235_v52 = vadd.f32 %v2501_v41, %v2234_v13  ;;  %v2698_v25 = vpop.f32.mrb[22].mxu0 }
 0x322   : > { %2309 = vst.msk [vmem:[%s3392_s18 + $0xc] sm:$0xf] %vm2305_vm0, %v2529_v57  ;;  %v2263_v44 = vadd.f32 %v2255_v0, %v2243_v50  ;;  %v2246_v54 = vadd.f32 %v2698_v25, %v2501_v41  ;;  %v2237_v46 = vpop.f32.mrb[23].mxu0 }
 0x323   : > { %2307 = vst.msk [vmem:[%s3392_s18 + $0x4] sm:$0xf] %vm2305_vm0, %v2527_v58  ;;  %v2261_v53 = vadd.f32 %v2253_v49, %v2235_v52  ;;  %v2238_v55 = vadd.f32 %v2501_v41, %v2237_v46 }
 0x324   : > { %v2271_v56 = vmax.f32 %v2263_v44, 0.0  ;;  %v2264_v59 = vadd.f32 %v2256_v51, %v2246_v54 }
 0x325   : > { %v2269_v42 = vmax.f32 %v2261_v53, 0.0  ;;  %v2262_v61 = vadd.f32 %v2254_v6, %v2238_v55 }
 0x326   : > { %v2532_v1 = vpack.c.bf16 %v2271_v56, %v2271_v56  ;;  %v2272_v63 = vmax.f32 %v2264_v59, 0.0 }
 0x327   : > { %v2530_v2 = vpack.c.bf16 %v2269_v42, %v2269_v42  ;;  %v2270_v22 = vmax.f32 %v2262_v61, 0.0 }
 0x328   : > { %2312 = vst.msk [vmem:[%s3392_s18 + $0x18] sm:$0xf] %vm2305_vm0, %v2532_v1  ;;  %v2533_v40 = vpack.c.bf16 %v2272_v63, %v2272_v63 }
 0x329   : > { %2310 = vst.msk [vmem:[%s3392_s18 + $0x10] sm:$0xf] %vm2305_vm0, %v2530_v2  ;;  %v2531_v9 = vpack.c.bf16 %v2270_v22, %v2270_v22 }
 0x32a   : > { %2313 = vst.msk [vmem:[%s3392_s18 + $0x1c] sm:$0xf] %vm2305_vm0, %v2533_v40 }
 0x32b   : > { %2311 = vst.msk [vmem:[%s3392_s18 + $0x14] sm:$0xf] %vm2305_vm0, %v2531_v9 }
 0x32c PF: > { %s17_s24 = sadd.s32 1, %s2816_s24  }
 0x32d   : > { %p14_p4 = scmp.ge.s32.totalorder %s17_s24, 4  }
 0x32f   :  { %16 = sbr.rel (!%p14_p4) target bundleno = 1 (0x1), region = 89 }

</bundles_post_ra>
